<compile_context>
chip_gen: v6e
topology: v6e:2x2x1
jax: 0.10.0
libtpu: 0.0.40
codegen_flags: <defaults>
</compile_context>

<pallas_src>
import functools

import jax
import jax.numpy as jnp
from jax.experimental import pallas as pl
from jax.experimental.pallas import tpu as pltpu

INPUT_DIM = 2
HIDDEN_DIM = 64
N_LAYERS = 4
B_TILE = 512   # batch-lane tile; sweep upward for production batches (keep the per-tile
               # working set well under the 64 MiB VMEM of a v7x TensorCore)


def flow_kernel(x_ref, w1_ref, b1_ref, w2_ref, b2_ref, w3_ref, b3_ref,
                z_ref, logdet_ref):
    x = x_ref[...]                      # [2, Bt]   feature-major
    x_a = x[0:1, :]                     # [1, Bt]   unchanged half (conditioning input)
    x_b = x[1:2, :]                     # [1, Bt]
    logdet = jnp.zeros_like(x_a)        # [1, Bt]

    # n_layers is small & static -> unrolled Python loop inside the kernel.
    for i in range(N_LAYERS):
        w1 = w1_ref[i]                  # [64, 1]
        b1 = b1_ref[i]                  # [64, 1]
        w2 = w2_ref[i]                  # [64, 64]  (pre-transposed: out x in)
        b2 = b2_ref[i]                  # [64, 1]
        w3 = w3_ref[i]                  # [2, 64]   (pre-transposed)
        b3 = b3_ref[i]                  # [2, 1]

        # Linear(1 -> 64): K=1, so run it on the VPU as a broadcast FMA instead of
        # wasting an MXU push/pop on a rank-1 product.
        h1 = jnp.maximum(w1 * x_a + b1, 0.0)                       # [64, Bt]

        # Linear(64 -> 64): MXU, wide N = Bt, f32 accumulation.
        # (f32 operands kept to preserve 1e-5 parity with the f32 reference; cast
        #  w2/h1 to bf16 here for ~2x MXU throughput on v6e/v7x if accuracy allows.)
        h2 = jnp.dot(w2, h1, preferred_element_type=jnp.float32) + b2
        h2 = jnp.maximum(h2, 0.0)                                  # [64, Bt]

        # Linear(64 -> 2), transposed so the result is [2, Bt] (lane-dense).
        params = jnp.dot(w3, h2, preferred_element_type=jnp.float32) + b3

        s = jnp.tanh(params[0:1, :])    # [1, Bt]
        t = params[1:2, :]              # [1, Bt]

        x_b = x_b * jnp.exp(s) + t
        logdet = logdet + s             # log_det = s.sum(dim=1) (feature half is size 1)

    z_ref[0:1, :] = x_a
    z_ref[1:2, :] = x_b
    logdet_ref[...] = logdet


def _round_up(n, m):
    return ((n + m - 1) // m) * m


@functools.partial(jax.jit, static_argnames=("b_tile",))
def normalizing_flow_forward(x, w1, b1, w2, b2, w3, b3, *, b_tile=B_TILE):
    B = x.shape[0]
    bt = min(b_tile, _round_up(B, 128))      # lane tile: multiple of 128
    B_pad = _round_up(B, bt)

    # Feature-major activations; pad the batch (lane) axis to a multiple of the tile.
    x_t = x.T                                 # [2, B]
    if B_pad != B:
        x_t = jnp.pad(x_t, ((0, 0), (0, B_pad - B)))

    # Pre-transpose the stacked weights once so the kernel needs no in-kernel transposes.
    w1_t = jnp.transpose(w1, (0, 2, 1))       # [L, 64, 1]
    b1_t = jnp.transpose(b1, (0, 2, 1))       # [L, 64, 1]
    w2_t = jnp.transpose(w2, (0, 2, 1))       # [L, 64, 64]
    b2_t = jnp.transpose(b2, (0, 2, 1))       # [L, 64, 1]
    w3_t = jnp.transpose(w3, (0, 2, 1))       # [L, 2, 64]
    b3_t = jnp.transpose(b3, (0, 2, 1))       # [L, 2, 1]

    def resident(arr):
        # Full-array weight block with a constant index_map -> stays resident in VMEM.
        return pl.BlockSpec(arr.shape, lambda i: (0,) * arr.ndim)

    weight_bytes = sum(a.size * 4 for a in (w1_t, b1_t, w2_t, b2_t, w3_t, b3_t))
    cost = pl.CostEstimate(
        flops=2 * N_LAYERS * B_pad * HIDDEN_DIM * (HIDDEN_DIM + 3),
        transcendentals=2 * N_LAYERS * B_pad,           # tanh + exp per layer per sample
        bytes_accessed=(INPUT_DIM + INPUT_DIM + 1) * B_pad * 4 + weight_bytes,
    )

    z_t, ld_t = pl.pallas_call(
        flow_kernel,
        out_shape=(
            jax.ShapeDtypeStruct((INPUT_DIM, B_pad), jnp.float32),
            jax.ShapeDtypeStruct((1, B_pad), jnp.float32),
        ),
        grid_spec=pltpu.PrefetchScalarGridSpec(
            num_scalar_prefetch=0,
            grid=(B_pad // bt,),
            in_specs=[
                pl.BlockSpec((INPUT_DIM, bt), lambda i: (0, i)),
                resident(w1_t), resident(b1_t),
                resident(w2_t), resident(b2_t),
                resident(w3_t), resident(b3_t),
            ],
            out_specs=(
                pl.BlockSpec((INPUT_DIM, bt), lambda i: (0, i)),
                pl.BlockSpec((1, bt), lambda i: (0, i)),
            ),
        ),
        compiler_params=pltpu.CompilerParams(
            dimension_semantics=("parallel",),   # shards batch tiles across TCs on v7x
        ),
        cost_estimate=cost,
    )(x_t, w1_t, b1_t, w2_t, b2_t, w3_t, b3_t)

    z = z_t[:, :B].T            # [B, 2]
    log_det_sum = ld_t[0, :B]   # [B]
    return z, log_det_sum


def init_params(key):
    """Deterministic init mimicking nn.Linear's uniform(-1/sqrt(fan_in), 1/sqrt(fan_in))."""
    d_in = INPUT_DIM // 2  # 1
    ks = jax.random.split(key, 6)

    def u(k, shape, fan_in):
        bound = 1.0 / jnp.sqrt(jnp.float32(fan_in))
        return jax.random.uniform(k, shape, jnp.float32, -bound, bound)

    w1 = u(ks[0], (N_LAYERS, d_in, HIDDEN_DIM), d_in)
    b1 = u(ks[1], (N_LAYERS, 1, HIDDEN_DIM), d_in)
    w2 = u(ks[2], (N_LAYERS, HIDDEN_DIM, HIDDEN_DIM), HIDDEN_DIM)
    b2 = u(ks[3], (N_LAYERS, 1, HIDDEN_DIM), HIDDEN_DIM)
    w3 = u(ks[4], (N_LAYERS, HIDDEN_DIM, d_in * 2), HIDDEN_DIM)
    b3 = u(ks[5], (N_LAYERS, 1, d_in * 2), HIDDEN_DIM)
    return w1, b1, w2, b2, w3, b3


def reference_forward(x, w1, b1, w2, b2, w3, b3):
    """Pure-JAX reference matching the PyTorch module semantics (original layout)."""
    x_a, x_b = x[:, 0:1], x[:, 1:2]
    logdet = jnp.zeros((x.shape[0],), jnp.float32)
    for i in range(N_LAYERS):
        h1 = jax.nn.relu(x_a @ w1[i] + b1[i])
        h2 = jax.nn.relu(h1 @ w2[i] + b2[i])
        p = h2 @ w3[i] + b3[i]
        s = jnp.tanh(p[:, 0:1])
        t = p[:, 1:2]
        x_b = x_b * jnp.exp(s) + t
        logdet = logdet + jnp.sum(s, axis=1)
    return jnp.concatenate([x_a, x_b], axis=1), logdet


if __name__ == "__main__":
    key = jax.random.PRNGKey(0)
    k_x, k_p = jax.random.split(key)

    B = 8
    x = jax.random.normal(k_x, (B, INPUT_DIM), jnp.float32)
    params = init_params(k_p)

    z, log_det_sum = normalizing_flow_forward(x, *params)
    z = jax.block_until_ready(z)
    log_det_sum = jax.block_until_ready(log_det_sum)

    z_ref, logdet_ref = reference_forward(x, *params)
    assert z.shape == (B, INPUT_DIM) and log_det_sum.shape == (B,)
    assert jnp.allclose(z, z_ref, atol=1e-5, rtol=1e-5)
    assert jnp.allclose(log_det_sum, logdet_ref, atol=1e-5, rtol=1e-5)

    print("KERNEL_OK")
</pallas_src>

<mosaic_0001>
module attributes {stable_mosaic.version = 11 : i64} {
  func.func @flow_kernel(%arg0: i32, %arg1: memref<2x128xf32, #tpu.memory_space<vmem>>, %arg2: memref<4x64x1xf32, #tpu.memory_space<vmem>>, %arg3: memref<4x64x1xf32, #tpu.memory_space<vmem>>, %arg4: memref<4x64x64xf32, #tpu.memory_space<vmem>>, %arg5: memref<4x64x1xf32, #tpu.memory_space<vmem>>, %arg6: memref<4x2x64xf32, #tpu.memory_space<vmem>>, %arg7: memref<4x2x1xf32, #tpu.memory_space<vmem>>, %arg8: memref<2x128xf32, #tpu.memory_space<vmem>>, %arg9: memref<1x128xf32, #tpu.memory_space<vmem>>) attributes {dimension_semantics = [#tpu.dimension_semantics<parallel>], iteration_bounds = array<i64: 1>, scalar_prefetch = 0 : i64, scratch_operands = 0 : i64, tpu.core_type = #tpu.core_type<tc>, window_params = [{transform_indices = @transform_0, window_bounds = array<i64: 2, 128>}, {pipeline_mode = #tpu.pipeline_mode<synchronous>, transform_indices = @transform_1, window_bounds = array<i64: 4, 64, 1>}, {pipeline_mode = #tpu.pipeline_mode<synchronous>, transform_indices = @transform_2, window_bounds = array<i64: 4, 64, 1>}, {pipeline_mode = #tpu.pipeline_mode<synchronous>, transform_indices = @transform_3, window_bounds = array<i64: 4, 64, 64>}, {pipeline_mode = #tpu.pipeline_mode<synchronous>, transform_indices = @transform_4, window_bounds = array<i64: 4, 64, 1>}, {pipeline_mode = #tpu.pipeline_mode<synchronous>, transform_indices = @transform_5, window_bounds = array<i64: 4, 2, 64>}, {pipeline_mode = #tpu.pipeline_mode<synchronous>, transform_indices = @transform_6, window_bounds = array<i64: 4, 2, 1>}, {transform_indices = @transform_7, window_bounds = array<i64: 2, 128>}, {transform_indices = @transform_8, window_bounds = array<i64: 1, 128>}]} {
    %c0 = arith.constant 0 : index
    %c0_0 = arith.constant 0 : index
    %0 = vector.load %arg1[%c0, %c0_0] : memref<2x128xf32, #tpu.memory_space<vmem>>, vector<2x128xf32>
    %1 = vector.extract_strided_slice %0 {offsets = [0, 0], sizes = [1, 128], strides = [1, 1]} : vector<2x128xf32> to vector<1x128xf32>
    %2 = vector.extract_strided_slice %0 {offsets = [1, 0], sizes = [1, 128], strides = [1, 1]} : vector<2x128xf32> to vector<1x128xf32>
    %cst = arith.constant 0.000000e+00 : f32
    %3 = vector.broadcast %cst : f32 to vector<1x128xf32>
    %c0_1 = arith.constant 0 : index
    %c0_2 = arith.constant 0 : index
    %c0_3 = arith.constant 0 : index
    %4 = vector.load %arg2[%c0_1, %c0_2, %c0_3] : memref<4x64x1xf32, #tpu.memory_space<vmem>>, vector<1x64x1xf32>
    %5 = vector.shape_cast %4 : vector<1x64x1xf32> to vector<64x1xf32>
    %c0_4 = arith.constant 0 : index
    %c0_5 = arith.constant 0 : index
    %c0_6 = arith.constant 0 : index
    %6 = vector.load %arg3[%c0_4, %c0_5, %c0_6] : memref<4x64x1xf32, #tpu.memory_space<vmem>>, vector<1x64x1xf32>
    %7 = vector.shape_cast %6 : vector<1x64x1xf32> to vector<64x1xf32>
    %c0_7 = arith.constant 0 : index
    %c0_8 = arith.constant 0 : index
    %c0_9 = arith.constant 0 : index
    %8 = vector.load %arg4[%c0_7, %c0_8, %c0_9] : memref<4x64x64xf32, #tpu.memory_space<vmem>>, vector<1x64x64xf32>
    %9 = vector.shape_cast %8 : vector<1x64x64xf32> to vector<64x64xf32>
    %c0_10 = arith.constant 0 : index
    %c0_11 = arith.constant 0 : index
    %c0_12 = arith.constant 0 : index
    %10 = vector.load %arg5[%c0_10, %c0_11, %c0_12] : memref<4x64x1xf32, #tpu.memory_space<vmem>>, vector<1x64x1xf32>
    %11 = vector.shape_cast %10 : vector<1x64x1xf32> to vector<64x1xf32>
    %c0_13 = arith.constant 0 : index
    %c0_14 = arith.constant 0 : index
    %c0_15 = arith.constant 0 : index
    %12 = vector.load %arg6[%c0_13, %c0_14, %c0_15] : memref<4x2x64xf32, #tpu.memory_space<vmem>>, vector<1x2x64xf32>
    %13 = vector.shape_cast %12 : vector<1x2x64xf32> to vector<2x64xf32>
    %c0_16 = arith.constant 0 : index
    %c0_17 = arith.constant 0 : index
    %c0_18 = arith.constant 0 : index
    %14 = vector.load %arg7[%c0_16, %c0_17, %c0_18] : memref<4x2x1xf32, #tpu.memory_space<vmem>>, vector<1x2x1xf32>
    %15 = vector.shape_cast %14 : vector<1x2x1xf32> to vector<2x1xf32>
    %16 = vector.broadcast %5 : vector<64x1xf32> to vector<64x128xf32>
    %17 = vector.broadcast %1 : vector<1x128xf32> to vector<64x128xf32>
    %18 = arith.mulf %16, %17 : vector<64x128xf32>
    %19 = vector.broadcast %7 : vector<64x1xf32> to vector<64x128xf32>
    %20 = arith.addf %18, %19 : vector<64x128xf32>
    %cst_19 = arith.constant 0.000000e+00 : f32
    %21 = vector.broadcast %cst_19 : f32 to vector<64x128xf32>
    %22 = arith.maximumf %20, %21 : vector<64x128xf32>
    %cst_20 = arith.constant dense<0.000000e+00> : vector<64x128xf32>
    %23 = tpu.matmul %9, %22, %cst_20 {dimension_numbers = #tpu.dot_dimension_numbers<[1], [0], [0], [1], [0, 0, 1, 1], [], []>} : vector<64x64xf32>, vector<64x128xf32>, vector<64x128xf32> -> vector<64x128xf32>
    %24 = vector.broadcast %11 : vector<64x1xf32> to vector<64x128xf32>
    %25 = arith.addf %23, %24 : vector<64x128xf32>
    %cst_21 = arith.constant 0.000000e+00 : f32
    %26 = vector.broadcast %cst_21 : f32 to vector<64x128xf32>
    %27 = arith.maximumf %25, %26 : vector<64x128xf32>
    %cst_22 = arith.constant dense<0.000000e+00> : vector<2x128xf32>
    %28 = tpu.matmul %13, %27, %cst_22 {dimension_numbers = #tpu.dot_dimension_numbers<[1], [0], [0], [1], [0, 0, 1, 1], [], []>} : vector<2x64xf32>, vector<64x128xf32>, vector<2x128xf32> -> vector<2x128xf32>
    %29 = vector.broadcast %15 : vector<2x1xf32> to vector<2x128xf32>
    %30 = arith.addf %28, %29 : vector<2x128xf32>
    %31 = vector.extract_strided_slice %30 {offsets = [0, 0], sizes = [1, 128], strides = [1, 1]} : vector<2x128xf32> to vector<1x128xf32>
    %32 = math.tanh %31 : vector<1x128xf32>
    %33 = vector.extract_strided_slice %30 {offsets = [1, 0], sizes = [1, 128], strides = [1, 1]} : vector<2x128xf32> to vector<1x128xf32>
    %34 = math.exp %32 : vector<1x128xf32>
    %35 = arith.mulf %2, %34 : vector<1x128xf32>
    %36 = arith.addf %35, %33 : vector<1x128xf32>
    %37 = arith.addf %3, %32 : vector<1x128xf32>
    %c1 = arith.constant 1 : index
    %c0_23 = arith.constant 0 : index
    %c0_24 = arith.constant 0 : index
    %38 = vector.load %arg2[%c1, %c0_23, %c0_24] : memref<4x64x1xf32, #tpu.memory_space<vmem>>, vector<1x64x1xf32>
    %39 = vector.shape_cast %38 : vector<1x64x1xf32> to vector<64x1xf32>
    %c1_25 = arith.constant 1 : index
    %c0_26 = arith.constant 0 : index
    %c0_27 = arith.constant 0 : index
    %40 = vector.load %arg3[%c1_25, %c0_26, %c0_27] : memref<4x64x1xf32, #tpu.memory_space<vmem>>, vector<1x64x1xf32>
    %41 = vector.shape_cast %40 : vector<1x64x1xf32> to vector<64x1xf32>
    %c1_28 = arith.constant 1 : index
    %c0_29 = arith.constant 0 : index
    %c0_30 = arith.constant 0 : index
    %42 = vector.load %arg4[%c1_28, %c0_29, %c0_30] : memref<4x64x64xf32, #tpu.memory_space<vmem>>, vector<1x64x64xf32>
    %43 = vector.shape_cast %42 : vector<1x64x64xf32> to vector<64x64xf32>
    %c1_31 = arith.constant 1 : index
    %c0_32 = arith.constant 0 : index
    %c0_33 = arith.constant 0 : index
    %44 = vector.load %arg5[%c1_31, %c0_32, %c0_33] : memref<4x64x1xf32, #tpu.memory_space<vmem>>, vector<1x64x1xf32>
    %45 = vector.shape_cast %44 : vector<1x64x1xf32> to vector<64x1xf32>
    %c1_34 = arith.constant 1 : index
    %c0_35 = arith.constant 0 : index
    %c0_36 = arith.constant 0 : index
    %46 = vector.load %arg6[%c1_34, %c0_35, %c0_36] : memref<4x2x64xf32, #tpu.memory_space<vmem>>, vector<1x2x64xf32>
    %47 = vector.shape_cast %46 : vector<1x2x64xf32> to vector<2x64xf32>
    %c1_37 = arith.constant 1 : index
    %c0_38 = arith.constant 0 : index
    %c0_39 = arith.constant 0 : index
    %48 = vector.load %arg7[%c1_37, %c0_38, %c0_39] : memref<4x2x1xf32, #tpu.memory_space<vmem>>, vector<1x2x1xf32>
    %49 = vector.shape_cast %48 : vector<1x2x1xf32> to vector<2x1xf32>
    %50 = vector.broadcast %39 : vector<64x1xf32> to vector<64x128xf32>
    %51 = vector.broadcast %1 : vector<1x128xf32> to vector<64x128xf32>
    %52 = arith.mulf %50, %51 : vector<64x128xf32>
    %53 = vector.broadcast %41 : vector<64x1xf32> to vector<64x128xf32>
    %54 = arith.addf %52, %53 : vector<64x128xf32>
    %cst_40 = arith.constant 0.000000e+00 : f32
    %55 = vector.broadcast %cst_40 : f32 to vector<64x128xf32>
    %56 = arith.maximumf %54, %55 : vector<64x128xf32>
    %cst_41 = arith.constant dense<0.000000e+00> : vector<64x128xf32>
    %57 = tpu.matmul %43, %56, %cst_41 {dimension_numbers = #tpu.dot_dimension_numbers<[1], [0], [0], [1], [0, 0, 1, 1], [], []>} : vector<64x64xf32>, vector<64x128xf32>, vector<64x128xf32> -> vector<64x128xf32>
    %58 = vector.broadcast %45 : vector<64x1xf32> to vector<64x128xf32>
    %59 = arith.addf %57, %58 : vector<64x128xf32>
    %cst_42 = arith.constant 0.000000e+00 : f32
    %60 = vector.broadcast %cst_42 : f32 to vector<64x128xf32>
    %61 = arith.maximumf %59, %60 : vector<64x128xf32>
    %cst_43 = arith.constant dense<0.000000e+00> : vector<2x128xf32>
    %62 = tpu.matmul %47, %61, %cst_43 {dimension_numbers = #tpu.dot_dimension_numbers<[1], [0], [0], [1], [0, 0, 1, 1], [], []>} : vector<2x64xf32>, vector<64x128xf32>, vector<2x128xf32> -> vector<2x128xf32>
    %63 = vector.broadcast %49 : vector<2x1xf32> to vector<2x128xf32>
    %64 = arith.addf %62, %63 : vector<2x128xf32>
    %65 = vector.extract_strided_slice %64 {offsets = [0, 0], sizes = [1, 128], strides = [1, 1]} : vector<2x128xf32> to vector<1x128xf32>
    %66 = math.tanh %65 : vector<1x128xf32>
    %67 = vector.extract_strided_slice %64 {offsets = [1, 0], sizes = [1, 128], strides = [1, 1]} : vector<2x128xf32> to vector<1x128xf32>
    %68 = math.exp %66 : vector<1x128xf32>
    %69 = arith.mulf %36, %68 : vector<1x128xf32>
    %70 = arith.addf %69, %67 : vector<1x128xf32>
    %71 = arith.addf %37, %66 : vector<1x128xf32>
    %c2 = arith.constant 2 : index
    %c0_44 = arith.constant 0 : index
    %c0_45 = arith.constant 0 : index
    %72 = vector.load %arg2[%c2, %c0_44, %c0_45] : memref<4x64x1xf32, #tpu.memory_space<vmem>>, vector<1x64x1xf32>
    %73 = vector.shape_cast %72 : vector<1x64x1xf32> to vector<64x1xf32>
    %c2_46 = arith.constant 2 : index
    %c0_47 = arith.constant 0 : index
    %c0_48 = arith.constant 0 : index
    %74 = vector.load %arg3[%c2_46, %c0_47, %c0_48] : memref<4x64x1xf32, #tpu.memory_space<vmem>>, vector<1x64x1xf32>
    %75 = vector.shape_cast %74 : vector<1x64x1xf32> to vector<64x1xf32>
    %c2_49 = arith.constant 2 : index
    %c0_50 = arith.constant 0 : index
    %c0_51 = arith.constant 0 : index
    %76 = vector.load %arg4[%c2_49, %c0_50, %c0_51] : memref<4x64x64xf32, #tpu.memory_space<vmem>>, vector<1x64x64xf32>
    %77 = vector.shape_cast %76 : vector<1x64x64xf32> to vector<64x64xf32>
    %c2_52 = arith.constant 2 : index
    %c0_53 = arith.constant 0 : index
    %c0_54 = arith.constant 0 : index
    %78 = vector.load %arg5[%c2_52, %c0_53, %c0_54] : memref<4x64x1xf32, #tpu.memory_space<vmem>>, vector<1x64x1xf32>
    %79 = vector.shape_cast %78 : vector<1x64x1xf32> to vector<64x1xf32>
    %c2_55 = arith.constant 2 : index
    %c0_56 = arith.constant 0 : index
    %c0_57 = arith.constant 0 : index
    %80 = vector.load %arg6[%c2_55, %c0_56, %c0_57] : memref<4x2x64xf32, #tpu.memory_space<vmem>>, vector<1x2x64xf32>
    %81 = vector.shape_cast %80 : vector<1x2x64xf32> to vector<2x64xf32>
    %c2_58 = arith.constant 2 : index
    %c0_59 = arith.constant 0 : index
    %c0_60 = arith.constant 0 : index
    %82 = vector.load %arg7[%c2_58, %c0_59, %c0_60] : memref<4x2x1xf32, #tpu.memory_space<vmem>>, vector<1x2x1xf32>
    %83 = vector.shape_cast %82 : vector<1x2x1xf32> to vector<2x1xf32>
    %84 = vector.broadcast %73 : vector<64x1xf32> to vector<64x128xf32>
    %85 = vector.broadcast %1 : vector<1x128xf32> to vector<64x128xf32>
    %86 = arith.mulf %84, %85 : vector<64x128xf32>
    %87 = vector.broadcast %75 : vector<64x1xf32> to vector<64x128xf32>
    %88 = arith.addf %86, %87 : vector<64x128xf32>
    %cst_61 = arith.constant 0.000000e+00 : f32
    %89 = vector.broadcast %cst_61 : f32 to vector<64x128xf32>
    %90 = arith.maximumf %88, %89 : vector<64x128xf32>
    %cst_62 = arith.constant dense<0.000000e+00> : vector<64x128xf32>
    %91 = tpu.matmul %77, %90, %cst_62 {dimension_numbers = #tpu.dot_dimension_numbers<[1], [0], [0], [1], [0, 0, 1, 1], [], []>} : vector<64x64xf32>, vector<64x128xf32>, vector<64x128xf32> -> vector<64x128xf32>
    %92 = vector.broadcast %79 : vector<64x1xf32> to vector<64x128xf32>
    %93 = arith.addf %91, %92 : vector<64x128xf32>
    %cst_63 = arith.constant 0.000000e+00 : f32
    %94 = vector.broadcast %cst_63 : f32 to vector<64x128xf32>
    %95 = arith.maximumf %93, %94 : vector<64x128xf32>
    %cst_64 = arith.constant dense<0.000000e+00> : vector<2x128xf32>
    %96 = tpu.matmul %81, %95, %cst_64 {dimension_numbers = #tpu.dot_dimension_numbers<[1], [0], [0], [1], [0, 0, 1, 1], [], []>} : vector<2x64xf32>, vector<64x128xf32>, vector<2x128xf32> -> vector<2x128xf32>
    %97 = vector.broadcast %83 : vector<2x1xf32> to vector<2x128xf32>
    %98 = arith.addf %96, %97 : vector<2x128xf32>
    %99 = vector.extract_strided_slice %98 {offsets = [0, 0], sizes = [1, 128], strides = [1, 1]} : vector<2x128xf32> to vector<1x128xf32>
    %100 = math.tanh %99 : vector<1x128xf32>
    %101 = vector.extract_strided_slice %98 {offsets = [1, 0], sizes = [1, 128], strides = [1, 1]} : vector<2x128xf32> to vector<1x128xf32>
    %102 = math.exp %100 : vector<1x128xf32>
    %103 = arith.mulf %70, %102 : vector<1x128xf32>
    %104 = arith.addf %103, %101 : vector<1x128xf32>
    %105 = arith.addf %71, %100 : vector<1x128xf32>
    %c3 = arith.constant 3 : index
    %c0_65 = arith.constant 0 : index
    %c0_66 = arith.constant 0 : index
    %106 = vector.load %arg2[%c3, %c0_65, %c0_66] : memref<4x64x1xf32, #tpu.memory_space<vmem>>, vector<1x64x1xf32>
    %107 = vector.shape_cast %106 : vector<1x64x1xf32> to vector<64x1xf32>
    %c3_67 = arith.constant 3 : index
    %c0_68 = arith.constant 0 : index
    %c0_69 = arith.constant 0 : index
    %108 = vector.load %arg3[%c3_67, %c0_68, %c0_69] : memref<4x64x1xf32, #tpu.memory_space<vmem>>, vector<1x64x1xf32>
    %109 = vector.shape_cast %108 : vector<1x64x1xf32> to vector<64x1xf32>
    %c3_70 = arith.constant 3 : index
    %c0_71 = arith.constant 0 : index
    %c0_72 = arith.constant 0 : index
    %110 = vector.load %arg4[%c3_70, %c0_71, %c0_72] : memref<4x64x64xf32, #tpu.memory_space<vmem>>, vector<1x64x64xf32>
    %111 = vector.shape_cast %110 : vector<1x64x64xf32> to vector<64x64xf32>
    %c3_73 = arith.constant 3 : index
    %c0_74 = arith.constant 0 : index
    %c0_75 = arith.constant 0 : index
    %112 = vector.load %arg5[%c3_73, %c0_74, %c0_75] : memref<4x64x1xf32, #tpu.memory_space<vmem>>, vector<1x64x1xf32>
    %113 = vector.shape_cast %112 : vector<1x64x1xf32> to vector<64x1xf32>
    %c3_76 = arith.constant 3 : index
    %c0_77 = arith.constant 0 : index
    %c0_78 = arith.constant 0 : index
    %114 = vector.load %arg6[%c3_76, %c0_77, %c0_78] : memref<4x2x64xf32, #tpu.memory_space<vmem>>, vector<1x2x64xf32>
    %115 = vector.shape_cast %114 : vector<1x2x64xf32> to vector<2x64xf32>
    %c3_79 = arith.constant 3 : index
    %c0_80 = arith.constant 0 : index
    %c0_81 = arith.constant 0 : index
    %116 = vector.load %arg7[%c3_79, %c0_80, %c0_81] : memref<4x2x1xf32, #tpu.memory_space<vmem>>, vector<1x2x1xf32>
    %117 = vector.shape_cast %116 : vector<1x2x1xf32> to vector<2x1xf32>
    %118 = vector.broadcast %107 : vector<64x1xf32> to vector<64x128xf32>
    %119 = vector.broadcast %1 : vector<1x128xf32> to vector<64x128xf32>
    %120 = arith.mulf %118, %119 : vector<64x128xf32>
    %121 = vector.broadcast %109 : vector<64x1xf32> to vector<64x128xf32>
    %122 = arith.addf %120, %121 : vector<64x128xf32>
    %cst_82 = arith.constant 0.000000e+00 : f32
    %123 = vector.broadcast %cst_82 : f32 to vector<64x128xf32>
    %124 = arith.maximumf %122, %123 : vector<64x128xf32>
    %cst_83 = arith.constant dense<0.000000e+00> : vector<64x128xf32>
    %125 = tpu.matmul %111, %124, %cst_83 {dimension_numbers = #tpu.dot_dimension_numbers<[1], [0], [0], [1], [0, 0, 1, 1], [], []>} : vector<64x64xf32>, vector<64x128xf32>, vector<64x128xf32> -> vector<64x128xf32>
    %126 = vector.broadcast %113 : vector<64x1xf32> to vector<64x128xf32>
    %127 = arith.addf %125, %126 : vector<64x128xf32>
    %cst_84 = arith.constant 0.000000e+00 : f32
    %128 = vector.broadcast %cst_84 : f32 to vector<64x128xf32>
    %129 = arith.maximumf %127, %128 : vector<64x128xf32>
    %cst_85 = arith.constant dense<0.000000e+00> : vector<2x128xf32>
    %130 = tpu.matmul %115, %129, %cst_85 {dimension_numbers = #tpu.dot_dimension_numbers<[1], [0], [0], [1], [0, 0, 1, 1], [], []>} : vector<2x64xf32>, vector<64x128xf32>, vector<2x128xf32> -> vector<2x128xf32>
    %131 = vector.broadcast %117 : vector<2x1xf32> to vector<2x128xf32>
    %132 = arith.addf %130, %131 : vector<2x128xf32>
    %133 = vector.extract_strided_slice %132 {offsets = [0, 0], sizes = [1, 128], strides = [1, 1]} : vector<2x128xf32> to vector<1x128xf32>
    %134 = math.tanh %133 : vector<1x128xf32>
    %135 = vector.extract_strided_slice %132 {offsets = [1, 0], sizes = [1, 128], strides = [1, 1]} : vector<2x128xf32> to vector<1x128xf32>
    %136 = math.exp %134 : vector<1x128xf32>
    %137 = arith.mulf %104, %136 : vector<1x128xf32>
    %138 = arith.addf %137, %135 : vector<1x128xf32>
    %139 = arith.addf %105, %134 : vector<1x128xf32>
    %c0_86 = arith.constant 0 : index
    %c0_87 = arith.constant 0 : index
    %140 = vector.load %arg8[%c0_86, %c0_87] : memref<2x128xf32, #tpu.memory_space<vmem>>, vector<1x128xf32>
    tpu.vector_store %arg8[%c0_86, %c0_87], %1 {strides = array<i32>} : memref<2x128xf32, #tpu.memory_space<vmem>>, vector<1x128xf32>,
    %c1_88 = arith.constant 1 : index
    %c0_89 = arith.constant 0 : index
    %141 = vector.load %arg8[%c1_88, %c0_89] : memref<2x128xf32, #tpu.memory_space<vmem>>, vector<1x128xf32>
    tpu.vector_store %arg8[%c1_88, %c0_89], %138 {strides = array<i32>} : memref<2x128xf32, #tpu.memory_space<vmem>>, vector<1x128xf32>,
    %c0_90 = arith.constant 0 : index
    %c0_91 = arith.constant 0 : index
    %142 = vector.load %arg9[%c0_90, %c0_91] : memref<1x128xf32, #tpu.memory_space<vmem>>, vector<1x128xf32>
    tpu.vector_store %arg9[%c0_90, %c0_91], %139 {strides = array<i32>} : memref<1x128xf32, #tpu.memory_space<vmem>>, vector<1x128xf32>,
    return
  }
  func.func @transform_0(%arg0: i32) -> (i32, i32) {
    %c0_i32 = arith.constant 0 : i32
    %c0_i32_0 = arith.constant 0 : i32
    return %c0_i32, %arg0 : i32, i32
  }
  func.func @transform_1(%arg0: i32) -> (i32, i32, i32) {
    %c0_i32 = arith.constant 0 : i32
    %c0_i32_0 = arith.constant 0 : i32
    %c0_i32_1 = arith.constant 0 : i32
    %c0_i32_2 = arith.constant 0 : i32
    return %c0_i32, %c0_i32_0, %c0_i32_1 : i32, i32, i32
  }
  func.func @transform_2(%arg0: i32) -> (i32, i32, i32) {
    %c0_i32 = arith.constant 0 : i32
    %c0_i32_0 = arith.constant 0 : i32
    %c0_i32_1 = arith.constant 0 : i32
    %c0_i32_2 = arith.constant 0 : i32
    return %c0_i32, %c0_i32_0, %c0_i32_1 : i32, i32, i32
  }
  func.func @transform_3(%arg0: i32) -> (i32, i32, i32) {
    %c0_i32 = arith.constant 0 : i32
    %c0_i32_0 = arith.constant 0 : i32
    %c0_i32_1 = arith.constant 0 : i32
    %c0_i32_2 = arith.constant 0 : i32
    return %c0_i32, %c0_i32_0, %c0_i32_1 : i32, i32, i32
  }
  func.func @transform_4(%arg0: i32) -> (i32, i32, i32) {
    %c0_i32 = arith.constant 0 : i32
    %c0_i32_0 = arith.constant 0 : i32
    %c0_i32_1 = arith.constant 0 : i32
    %c0_i32_2 = arith.constant 0 : i32
    return %c0_i32, %c0_i32_0, %c0_i32_1 : i32, i32, i32
  }
  func.func @transform_5(%arg0: i32) -> (i32, i32, i32) {
    %c0_i32 = arith.constant 0 : i32
    %c0_i32_0 = arith.constant 0 : i32
    %c0_i32_1 = arith.constant 0 : i32
    %c0_i32_2 = arith.constant 0 : i32
    return %c0_i32, %c0_i32_0, %c0_i32_1 : i32, i32, i32
  }
  func.func @transform_6(%arg0: i32) -> (i32, i32, i32) {
    %c0_i32 = arith.constant 0 : i32
    %c0_i32_0 = arith.constant 0 : i32
    %c0_i32_1 = arith.constant 0 : i32
    %c0_i32_2 = arith.constant 0 : i32
    return %c0_i32, %c0_i32_0, %c0_i32_1 : i32, i32, i32
  }
  func.func @transform_7(%arg0: i32) -> (i32, i32) {
    %c0_i32 = arith.constant 0 : i32
    %c0_i32_0 = arith.constant 0 : i32
    return %c0_i32, %arg0 : i32, i32
  }
  func.func @transform_8(%arg0: i32) -> (i32, i32) {
    %c0_i32 = arith.constant 0 : i32
    %c0_i32_0 = arith.constant 0 : i32
    return %c0_i32, %arg0 : i32, i32
  }
}

</mosaic_0001>

<bundles_post_ra>
// kernel: normalizing_flow_forward.1
= control target key start
LH: loop header
LB: loop body
LE: loop exit
PB: predicated region body
PF: predicated region fallthrough
CT: control target
= control target key end

     0   :  { %v2118_v0 = vmov 0   ;;  %vm211_vm0 = vcmask 523264   ;;  %v103_v58 = vlaneseq  ;;  %vm2120_vm1 = vmmov 0   ;;  %s2701_s2 = inlined_call_operand.vmem [shape: f32[4,64,1], index: 2, kind: input, shape index: {}]   ;;  %s2702_s1 = inlined_call_operand.vmem [shape: f32[4,64,1], index: 1, kind: input, shape index: {}]   ;;  %s2703_s3 = inlined_call_operand.vmem [shape: f32[4,64,64], index: 3, kind: input, shape index: {}]   ;;  %s2704_s0 = inlined_call_operand.vmem [shape: f32[2,128], index: 0, kind: input, shape index: {}]   ;;  %s2705_s4 = inlined_call_operand.vmem [shape: f32[4,64,1], index: 4, kind: input, shape index: {}]   ;;  %s2706_s6 = inlined_call_operand.vmem [shape: f32[4,2,1], index: 6, kind: input, shape index: {}]   ;;  %s2707_s5 = inlined_call_operand.vmem [shape: f32[4,2,64], index: 5, kind: input, shape index: {}]   ;;  %s2708_s7 = inlined_call_operand.vmem [shape: f32[2,128], index: 7, kind: output, shape index: {0}]   ;;  %s2709_s8 = inlined_call_operand.vmem [shape: f32[1,128], index: 8, kind: output, shape index: {1}]  }
   0x1   :  { %2101 = vset.pattern.permute.xlu1 %v2118_v0  ;;  %2100 = vset.pattern.permute.xlu0 %v2118_v0  ;;  %v44_v1 = vld [vmem:[%s2701_s2 + $0x38] sm:$0xff]  ;;  %v35_v3 = vld [vmem:[%s2702_s1 + $0x30] sm:$0xff]  ;;  %v34_v4 = vld [vmem:[%s2702_s1 + $0x28] sm:$0xff] }
   0x2   :  { %v36_v2 = vld [vmem:[%s2702_s1 + $0x38] sm:$0xff]  ;;  %152 = vperm.xlu1 %2101, %v44_v1   ;;  %v43_v5 = vld [vmem:[%s2701_s2 + $0x30] sm:$0xff]  ;;  %v33_v6 = vld [vmem:[%s2702_s1 + $0x20] sm:$0xff]  ;;  %v104_v61 = vshrl.u32 %v103_v58, 7 }
   0x3   :  { %100 = vperm.xlu0 %2100, %v36_v2   ;;  %v42_v7 = vld [vmem:[%s2701_s2 + $0x28] sm:$0xff]  ;;  %v32_v8 = vld [vmem:[%s2702_s1 + $0x18] sm:$0xff]  ;;  %v41_v9 = vld [vmem:[%s2701_s2 + $0x20] sm:$0xff] }
   0x4   :  { %v31_v10 = vld [vmem:[%s2702_s1 + $0x10] sm:$0xff]  ;;  %v40_v11 = vld [vmem:[%s2701_s2 + $0x18] sm:$0xff]  ;;  %v30_v12 = vld [vmem:[%s2702_s1 + $0x8] sm:$0xff]  ;;  %v105_v0 = vsub.s32 0, %v104_v61 }
   0x5   :  { %v39_v13 = vld [vmem:[%s2701_s2 + $0x10] sm:$0xff]  ;;  %v29_v14 = vld [vmem:[%s2702_s1] sm:$0xff]  ;;  %v38_v15 = vld [vmem:[%s2701_s2 + $0x8] sm:$0xff] }
   0x6   :  { %90 = vperm.xlu1 %2101, %v34_v4   ;;  %v37_v16 = vld [vmem:[%s2701_s2] sm:$0xff]  ;;  %v1687_v17 = vld [vmem:[%s2702_s1 + $0x78] sm:$0xff]  ;;  %v1686_v18 = vld [vmem:[%s2702_s1 + $0x70] sm:$0xff] }
   0x7   :  { %95 = vperm.xlu0 %2100, %v35_v3   ;;  %v45_v19 = vld [vmem:[%s2703_s3] sm:$0xff]  ;;  %v1695_v20 = vld [vmem:[%s2701_s2 + $0x78] sm:$0xff]  ;;  %v1685_v21 = vld [vmem:[%s2702_s1 + $0x68] sm:$0xff] }
   0x8   :  { %1925 = vmatprep.mubr.msk.f32.mxu0 %vm211_vm0, %v45_v19  ;;  %v1694_v22 = vld [vmem:[%s2701_s2 + $0x70] sm:$0xff]  ;;  %v1684_v23 = vld [vmem:[%s2702_s1 + $0x60] sm:$0xff]  ;;  %v1693_v24 = vld [vmem:[%s2701_s2 + $0x68] sm:$0xff] }
   0x9   :  { %v1683_v25 = vld [vmem:[%s2702_s1 + $0x58] sm:$0xff]  ;;  %v1692_v26 = vld [vmem:[%s2701_s2 + $0x60] sm:$0xff]  ;;  %v1682_v27 = vld [vmem:[%s2702_s1 + $0x50] sm:$0xff] }
   0xa   :  { %85 = vperm.xlu1 %2101, %v33_v6   ;;  %v1691_v28 = vld [vmem:[%s2701_s2 + $0x58] sm:$0xff]  ;;  %v1681_v29 = vld [vmem:[%s2702_s1 + $0x48] sm:$0xff]  ;;  %v1690_v30 = vld [vmem:[%s2701_s2 + $0x50] sm:$0xff] }
   0xb   :  { %147 = vperm.xlu0 %2100, %v43_v5   ;;  %v1680_v31 = vld [vmem:[%s2702_s1 + $0x40] sm:$0xff]  ;;  %v1689_v32 = vld [vmem:[%s2701_s2 + $0x48] sm:$0xff]  ;;  %v1730_v34 = vld [vmem:[%s2702_s1 + $0xb8] sm:$0xff] }
   0xc   :  { %v1688_v33 = vld [vmem:[%s2701_s2 + $0x40] sm:$0xff]  ;;  %v1729_v35 = vld [vmem:[%s2702_s1 + $0xb0] sm:$0xff]  ;;  %v1738_v36 = vld [vmem:[%s2701_s2 + $0xb8] sm:$0xff] }
   0xd   :  { %v1728_v37 = vld [vmem:[%s2702_s1 + $0xa8] sm:$0xff]  ;;  %v1737_v38 = vld [vmem:[%s2701_s2 + $0xb0] sm:$0xff]  ;;  %v1727_v39 = vld [vmem:[%s2702_s1 + $0xa0] sm:$0xff] }
   0xe   :  { %80 = vperm.xlu1 %2101, %v32_v8   ;;  %v1736_v40 = vld [vmem:[%s2701_s2 + $0xa8] sm:$0xff]  ;;  %v1726_v41 = vld [vmem:[%s2702_s1 + $0x98] sm:$0xff]  ;;  %v1735_v42 = vld [vmem:[%s2701_s2 + $0xa0] sm:$0xff] }
   0xf   :  { %142 = vperm.xlu0 %2100, %v42_v7   ;;  %v1725_v43 = vld [vmem:[%s2702_s1 + $0x90] sm:$0xff]  ;;  %v1734_v44 = vld [vmem:[%s2701_s2 + $0x98] sm:$0xff]  ;;  %v1724_v45 = vld [vmem:[%s2702_s1 + $0x88] sm:$0xff] }
  0x10   :  { %v1733_v46 = vld [vmem:[%s2701_s2 + $0x90] sm:$0xff]  ;;  %v1723_v47 = vld [vmem:[%s2702_s1 + $0x80] sm:$0xff]  ;;  %v1732_v48 = vld [vmem:[%s2701_s2 + $0x88] sm:$0xff] }
  0x11   :  { %v1731_v49 = vld [vmem:[%s2701_s2 + $0x80] sm:$0xff]  ;;  %v1773_v50 = vld [vmem:[%s2702_s1 + $0xf8] sm:$0xff]  ;;  %v1772_v51 = vld [vmem:[%s2702_s1 + $0xf0] sm:$0xff] }
  0x12   :  { %75 = vperm.xlu1 %2101, %v31_v10   ;;  %v1781_v52 = vld [vmem:[%s2701_s2 + $0xf8] sm:$0xff]  ;;  %v1771_v53 = vld [vmem:[%s2702_s1 + $0xe8] sm:$0xff]  ;;  %v1780_v54 = vld [vmem:[%s2701_s2 + $0xf0] sm:$0xff] }
  0x13   :  { %137 = vperm.xlu0 %2100, %v41_v9   ;;  %v1770_v55 = vld [vmem:[%s2702_s1 + $0xe0] sm:$0xff]  ;;  %v1779_v56 = vld [vmem:[%s2701_s2 + $0xe8] sm:$0xff]  ;;  %v1769_v57 = vld [vmem:[%s2702_s1 + $0xd8] sm:$0xff] }
  0x14   :  { %v1778_v59 = vld [vmem:[%s2701_s2 + $0xe0] sm:$0xff]  ;;  %v1768_v60 = vld [vmem:[%s2702_s1 + $0xd0] sm:$0xff]  ;;  %v1777_v62 = vld [vmem:[%s2701_s2 + $0xd8] sm:$0xff] }
  0x15   :  { %v1767_v63 = vld [vmem:[%s2702_s1 + $0xc8] sm:$0xff]  ;;  %v1776_v1 = vld [vmem:[%s2701_s2 + $0xd0] sm:$0xff]  ;;  %v1766_v2 = vld [vmem:[%s2702_s1 + $0xc0] sm:$0xff] }
  0x16   :  { %70 = vperm.xlu1 %2101, %v30_v12   ;;  %v2359_v3 = vld [vmem:[%s2704_s0] sm:$0x3]  ;;  %v1775_v5 = vld [vmem:[%s2701_s2 + $0xc8] sm:$0xff]  ;;  %v60_v10 = vld [vmem:[%s2705_s4 + $0x38] sm:$0xff] }
  0x17   :  { %132 = vperm.xlu0 %2100, %v40_v11   ;;  %v2362_v4 = vrot.slane %v2359_v3, %v105_v0  ;;  %v1774_v6 = vld [vmem:[%s2701_s2 + $0xc0] sm:$0xff]  ;;  %v59_v11 = vld [vmem:[%s2705_s4 + $0x30] sm:$0xff]  ;;  %1660 = vst [vmem:[%s2708_s7] sm:$0x1] %v2359_v3 }
  0x1a   :  { %65 = vperm.xlu1 %2101, %v29_v14  }
  0x1b   :  { %127 = vperm.xlu0 %2100, %v39_v13  }
  0x1e   :  { %117 = vperm.xlu1 %2101, %v37_v16   ;;  %v58_v16 = vld [vmem:[%s2705_s4 + $0x28] sm:$0xff] }
  0x1f   :  { %122 = vperm.xlu0 %2100, %v38_v15  }
  0x22   :  { %508 = vperm.xlu1 %2101, %v1686_v18  }
  0x23   :  { %513 = vperm.xlu0 %2100, %v1687_v17   ;;  %v57_v17 = vld [vmem:[%s2705_s4 + $0x20] sm:$0xff] }
  0x26   :  { %503 = vperm.xlu1 %2101, %v1685_v21  }
  0x27   :  { %561 = vperm.xlu0 %2100, %v1695_v20  }
  0x2a   :  { %498 = vperm.xlu1 %2101, %v1684_v23   ;;  %v55_v23 = vld [vmem:[%s2705_s4 + $0x10] sm:$0xff] }
  0x2b   :  { %556 = vperm.xlu0 %2100, %v1694_v22   ;;  %v56_v22 = vld [vmem:[%s2705_s4 + $0x18] sm:$0xff] }
  0x2e   :  { %493 = vperm.xlu1 %2101, %v1683_v25  }
  0x2f   :  { %551 = vperm.xlu0 %2100, %v1693_v24  }
  0x32   :  { %488 = vperm.xlu1 %2101, %v1682_v27  }
  0x33   :  { %546 = vperm.xlu0 %2100, %v1692_v26  }
  0x36   :  { %483 = vperm.xlu1 %2101, %v1681_v29   ;;  %v54_v29 = vld [vmem:[%s2705_s4 + $0x8] sm:$0xff] }
  0x37   :  { %541 = vperm.xlu0 %2100, %v1691_v28  }
  0x3a   :  { %478 = vperm.xlu1 %2101, %v1680_v31  }
  0x3b   :  { %536 = vperm.xlu0 %2100, %v1690_v30   ;;  %v53_v30 = vld [vmem:[%s2705_s4] sm:$0xff] }
  0x3e   :  { %526 = vperm.xlu1 %2101, %v1688_v33  }
  0x3f   :  { %531 = vperm.xlu0 %2100, %v1689_v32  }
  0x42   :  { %916 = vperm.xlu1 %2101, %v1729_v35  }
  0x43   :  { %921 = vperm.xlu0 %2100, %v1730_v34  }
  0x46   :  { %911 = vperm.xlu1 %2101, %v1728_v37   ;;  %v1710_v37 = vld [vmem:[%s2705_s4 + $0x70] sm:$0xff] }
  0x47   :  { %969 = vperm.xlu0 %2100, %v1738_v36   ;;  %v1711_v36 = vld [vmem:[%s2705_s4 + $0x78] sm:$0xff] }
  0x4a   :  { %906 = vperm.xlu1 %2101, %v1727_v39  }
  0x4b   :  { %964 = vperm.xlu0 %2100, %v1737_v38  }
  0x4e   :  { %901 = vperm.xlu1 %2101, %v1726_v41  }
  0x4f   :  { %959 = vperm.xlu0 %2100, %v1736_v40  }
  0x52   :  { %896 = vperm.xlu1 %2101, %v1725_v43   ;;  %v1709_v43 = vld [vmem:[%s2705_s4 + $0x68] sm:$0xff] }
  0x53   :  { %954 = vperm.xlu0 %2100, %v1735_v42  }
  0x56   :  { %891 = vperm.xlu1 %2101, %v1724_v45  }
  0x57   :  { %949 = vperm.xlu0 %2100, %v1734_v44   ;;  %v1708_v44 = vld [vmem:[%s2705_s4 + $0x60] sm:$0xff] }
  0x5a   :  { %886 = vperm.xlu1 %2101, %v1723_v47  }
  0x5b   :  { %944 = vperm.xlu0 %2100, %v1733_v46  }
  0x5e   :  { %934 = vperm.xlu1 %2101, %v1731_v49  }
  0x5f   :  { %939 = vperm.xlu0 %2100, %v1732_v48  }
  0x62   :  { %1324 = vperm.xlu1 %2101, %v1772_v51   ;;  %v1706_v51 = vld [vmem:[%s2705_s4 + $0x50] sm:$0xff] }
  0x63   :  { %1329 = vperm.xlu0 %2100, %v1773_v50   ;;  %v1707_v50 = vld [vmem:[%s2705_s4 + $0x58] sm:$0xff] }
  0x66   :  { %1319 = vperm.xlu1 %2101, %v1771_v53  }
  0x67   :  { %1377 = vperm.xlu0 %2100, %v1781_v52  }
  0x6a   :  { %1314 = vperm.xlu1 %2101, %v1770_v55  }
  0x6b   :  { %1372 = vperm.xlu0 %2100, %v1780_v54  }
  0x6e   :  { %1309 = vperm.xlu1 %2101, %v1769_v57  }
  0x6f   :  { %1367 = vperm.xlu0 %2100, %v1779_v56  }
  0x72   :  { %1304 = vperm.xlu1 %2101, %v1768_v60   ;;  %v1704_v60 = vld [vmem:[%s2705_s4 + $0x40] sm:$0xff] }
  0x73   :  { %1362 = vperm.xlu0 %2100, %v1778_v59   ;;  %v1705_v59 = vld [vmem:[%s2705_s4 + $0x48] sm:$0xff] }
  0x76   :  { %1299 = vperm.xlu1 %2101, %v1767_v63  }
  0x77   :  { %1357 = vperm.xlu0 %2100, %v1777_v62  }
  0x7a   :  { %1294 = vperm.xlu1 %2101, %v1766_v2  }
  0x7b   :  { %1352 = vperm.xlu0 %2100, %v1776_v1   ;;  %v1754_v1 = vld [vmem:[%s2705_s4 + $0xb8] sm:$0xff] }
  0x7d   :  { %v153_v7 = vpop.permute.xlu1 %152 }
  0x7e   :  { %v101_v8 = vpop.permute.xlu0 %100  ;;  %1342 = vperm.xlu1 %2101, %v1774_v6   ;;  %v46_v6 = vld [vmem:[%s2703_s3 + $0x8] sm:$0xff] }
  0x7f   :  { %v114_v9 = vmul.f32 %v2362_v4, %v101_v8  ;;  %1347 = vperm.xlu0 %2100, %v1775_v5   ;;  %v1753_v5 = vld [vmem:[%s2705_s4 + $0xb0] sm:$0xff] }
  0x81   :  { %v162_v12 = vadd.f32 %v153_v7, %v114_v9  ;;  %v91_v14 = vpop.permute.xlu1 %90  ;;  %v47_v9 = vld [vmem:[%s2703_s3 + $0x10] sm:$0xff] }
  0x82   :  { %v96_v13 = vpop.permute.xlu0 %95  ;;  %203 = vperm.xlu1 %2101, %v59_v11   ;;  %v112_v24 = vmul.f32 %v2362_v4, %v91_v14  ;;  %v1752_v11 = vld [vmem:[%s2705_s4 + $0xa8] sm:$0xff]  ;;  %v1751_v14 = vld [vmem:[%s2705_s4 + $0xa0] sm:$0xff] }
  0x83   :  { %208 = vperm.xlu0 %2100, %v60_v10   ;;  %v170_v15 = vmax.f32 %v162_v12, 0.0  ;;  %v113_v18 = vmul.f32 %v2362_v4, %v96_v13 }
  0x85   :  { %1909 = vmatprep.subr.mxu0 %v170_v15  ;;  %v86_v20 = vpop.permute.xlu1 %85 }
  0x86   :  { %v148_v19 = vpop.permute.xlu0 %147  ;;  %1910 = vmatpush3.msra.mxu0 %v170_v15  ;;  %193 = vperm.xlu1 %2101, %v57_v17   ;;  %v111_v31 = vmul.f32 %v2362_v4, %v86_v20  ;;  %v48_v15 = vld [vmem:[%s2703_s3 + $0x18] sm:$0xff] }
  0x87   :  { %v161_v21 = vadd.f32 %v148_v19, %v113_v18  ;;  %198 = vperm.xlu0 %2100, %v58_v16   ;;  %v49_v18 = vld [vmem:[%s2703_s3 + $0x20] sm:$0xff]  ;;  %v1750_v20 = vld [vmem:[%s2705_s4 + $0x98] sm:$0xff] }
  0x89   :  { %v169_v25 = vmax.f32 %v161_v21, 0.0  ;;  %v81_v27 = vpop.permute.xlu1 %80 }
  0x8a   :  { %v143_v26 = vpop.permute.xlu0 %142  ;;  %183 = vperm.xlu1 %2101, %v55_v23   ;;  %v110_v38 = vmul.f32 %v2362_v4, %v81_v27  ;;  %v1749_v23 = vld [vmem:[%s2705_s4 + $0x90] sm:$0xff] }
  0x8b   :  { %v160_v28 = vadd.f32 %v143_v26, %v112_v24  ;;  %188 = vperm.xlu0 %2100, %v56_v22   ;;  %1911 = vmatprep.subr.mxu0 %v169_v25  ;;  %v50_v24 = vld [vmem:[%s2703_s3 + $0x28] sm:$0xff]  ;;  %v51_v27 = vld [vmem:[%s2703_s3 + $0x30] sm:$0xff] }
  0x8c   :  { %1912 = vmatpush3.msra.mxu0 %v169_v25 }
  0x8d   :  { %v168_v32 = vmax.f32 %v160_v28, 0.0  ;;  %v76_v34 = vpop.permute.xlu1 %75 }
  0x8e   :  { %v138_v33 = vpop.permute.xlu0 %137  ;;  %173 = vperm.xlu1 %2101, %v53_v30   ;;  %v109_v45 = vmul.f32 %v2362_v4, %v76_v34 }
  0x8f   :  { %v159_v35 = vadd.f32 %v138_v33, %v111_v31  ;;  %178 = vperm.xlu0 %2100, %v54_v29   ;;  %1913 = vmatprep.subr.mxu0 %v168_v32  ;;  %v1748_v29 = vld [vmem:[%s2705_s4 + $0x88] sm:$0xff]  ;;  %v52_v33 = vld [vmem:[%s2703_s3 + $0x38] sm:$0xff] }
  0x90   :  { %1914 = vmatpush3.msra.mxu0 %v168_v32  ;;  %v1747_v32 = vld [vmem:[%s2705_s4 + $0x80] sm:$0xff] }
  0x91   :  { %v167_v39 = vmax.f32 %v159_v35, 0.0  ;;  %v71_v41 = vpop.permute.xlu1 %70 }
  0x92   :  { %v133_v40 = vpop.permute.xlu0 %132  ;;  %612 = vperm.xlu1 %2101, %v1710_v37   ;;  %v108_v52 = vmul.f32 %v2362_v4, %v71_v41  ;;  %v1796_v41 = vld [vmem:[%s2705_s4 + $0xf0] sm:$0xff] }
  0x93   :  { %v158_v42 = vadd.f32 %v133_v40, %v110_v38  ;;  %617 = vperm.xlu0 %2100, %v1711_v36   ;;  %1915 = vmatprep.subr.mxu0 %v167_v39  ;;  %v1696_v36 = vld [vmem:[%s2703_s3 + $0x40] sm:$0xff]  ;;  %v1797_v38 = vld [vmem:[%s2705_s4 + $0xf8] sm:$0xff] }
  0x94   :  { %1916 = vmatpush3.msra.mxu0 %v167_v39 }
  0x95   :  { %v166_v46 = vmax.f32 %v158_v42, 0.0  ;;  %v66_v48 = vpop.permute.xlu1 %65 }
  0x96   :  { %v128_v47 = vpop.permute.xlu0 %127  ;;  %602 = vperm.xlu1 %2101, %v1708_v44   ;;  %v107_v54 = vmul.f32 %v2362_v4, %v66_v48  ;;  %v1794_v48 = vld [vmem:[%s2705_s4 + $0xe0] sm:$0xff] }
  0x97   :  { %v157_v49 = vadd.f32 %v128_v47, %v109_v45  ;;  %607 = vperm.xlu0 %2100, %v1709_v43   ;;  %1917 = vmatprep.subr.mxu0 %v166_v46  ;;  %v1795_v45 = vld [vmem:[%s2705_s4 + $0xe8] sm:$0xff] }
  0x98   :  { %1918 = vmatpush3.msra.mxu0 %v166_v46 }
  0x99   :  { %v165_v53 = vmax.f32 %v157_v49, 0.0  ;;  %v118_v56 = vpop.permute.xlu1 %117 }
  0x9a   :  { %v123_v55 = vpop.permute.xlu0 %122  ;;  %592 = vperm.xlu1 %2101, %v1706_v51   ;;  %v155_v58 = vadd.f32 %v118_v56, %v107_v54  ;;  %v1792_v56 = vld [vmem:[%s2705_s4 + $0xd0] sm:$0xff] }
  0x9b   :  { %v156_v57 = vadd.f32 %v123_v55, %v108_v52  ;;  %597 = vperm.xlu0 %2100, %v1707_v50   ;;  %1919 = vmatprep.subr.mxu0 %v165_v53  ;;  %v1793_v52 = vld [vmem:[%s2705_s4 + $0xd8] sm:$0xff] }
  0x9c   :  { %1920 = vmatpush3.msra.mxu0 %v165_v53  ;;  %v163_v0 = vmax.f32 %v155_v58, 0.0 }
  0x9d   :  { %v164_v61 = vmax.f32 %v156_v57, 0.0  ;;  %v509_v63 = vpop.permute.xlu1 %508 }
  0x9e   :  { %v514_v62 = vpop.permute.xlu0 %513  ;;  %582 = vperm.xlu1 %2101, %v1704_v60   ;;  %v522_v12 = vmul.f32 %v509_v63, %v2362_v4  ;;  %v1790_v63 = vld [vmem:[%s2705_s4 + $0xc0] sm:$0xff] }
  0x9f   :  { %587 = vperm.xlu0 %2100, %v1705_v59   ;;  %1921 = vmatprep.subr.mxu0 %v164_v61  ;;  %v523_v2 = vmul.f32 %v514_v62, %v2362_v4 }
  0xa0   :  { %1922 = vmatpush3.msra.mxu0 %v164_v61  ;;  %v1791_v61 = vld [vmem:[%s2705_s4 + $0xc8] sm:$0xff] }
  0xa1   :  { %1923 = vmatprep.subr.mxu0 %v163_v0  ;;  %v504_v8 = vpop.permute.xlu1 %503 }
  0xa2   :  { %v562_v7 = vpop.permute.xlu0 %561  ;;  %1924 = vmatpush3.msra.mxu0 %v163_v0  ;;  %1020 = vperm.xlu1 %2101, %v1753_v5   ;;  %v521_v21 = vmul.f32 %v504_v8, %v2362_v4  ;;  %v62_v5 = vld [vmem:[%s2706_s6] sm:$0x3]  ;;  %v1713_v8 = vld [vmem:[%s2706_s6 + $0x2] sm:$0x3] }
  0xa3   :  { %v571_v10 = vadd.f32 %v562_v7, %v523_v2  ;;  %1025 = vperm.xlu0 %2100, %v1754_v1   ;;  %1926 = vmatmul.mubr.msk.f32.vlgmr.msra.gmra.mxu0 %vm211_vm0, %v46_v6  ;;  %v1697_v6 = vld [vmem:[%s2703_s3 + $0x48] sm:$0xff] }
  0xa4   :  { %1928 = vmatprep.mubr.msk.f32.mxu0 %vm211_vm0, %v47_v9  ;;  %v1698_v9 = vld [vmem:[%s2703_s3 + $0x50] sm:$0xff] }
  0xa5   :  { %v579_v13 = vmax.f32 %v571_v10, 0.0  ;;  %v499_v17 = vpop.permute.xlu1 %498 }
  0xa6   :  { %v557_v16 = vpop.permute.xlu0 %556  ;;  %1010 = vperm.xlu1 %2101, %v1751_v14   ;;  %v520_v30 = vmul.f32 %v499_v17, %v2362_v4  ;;  %v1699_v14 = vld [vmem:[%s2703_s3 + $0x58] sm:$0xff]  ;;  %v1799_v17 = vld [vmem:[%s2706_s6 + $0x6] sm:$0x3] }
  0xa7   :  { %v570_v19 = vadd.f32 %v557_v16, %v522_v12  ;;  %1015 = vperm.xlu0 %2100, %v1752_v11   ;;  %1956 = vmatprep.subr.mxu0 %v579_v13 }
  0xa8   :  { %1929 = vmatmul.mubr.msk.f32.gmra.mxu0 %vm211_vm0, %v48_v15 }
  0xa9   :  { %v578_v22 = vmax.f32 %v570_v19, 0.0  ;;  %1957 = vmatpush3.msra.mxu0 %v579_v13  ;;  %1931 = vmatprep.mubr.msk.f32.mxu0 %vm211_vm0, %v49_v18  ;;  %v494_v26 = vpop.permute.xlu1 %493  ;;  %v1756_v13 = vld [vmem:[%s2706_s6 + $0x4] sm:$0x3] }
  0xaa   :  { %v552_v25 = vpop.permute.xlu0 %551  ;;  %1000 = vperm.xlu1 %2101, %v1749_v23   ;;  %v519_v39 = vmul.f32 %v494_v26, %v2362_v4 }
  0xab   :  { %v569_v28 = vadd.f32 %v552_v25, %v521_v21  ;;  %1005 = vperm.xlu0 %2100, %v1750_v20   ;;  %1958 = vmatprep.subr.mxu0 %v578_v22  ;;  %v1700_v20 = vld [vmem:[%s2703_s3 + $0x60] sm:$0xff]  ;;  %v1702_v25 = vld [vmem:[%s2703_s3 + $0x70] sm:$0xff] }
  0xac   :  { %1932 = vmatmul.mubr.msk.f32.gmra.mxu0 %vm211_vm0, %v50_v24 }
  0xad   :  { %v577_v31 = vmax.f32 %v569_v28, 0.0  ;;  %1959 = vmatpush3.msra.mxu0 %v578_v22  ;;  %1934 = vmatprep.mubr.msk.f32.mxu0 %vm211_vm0, %v51_v27  ;;  %v489_v35 = vpop.permute.xlu1 %488  ;;  %v1701_v22 = vld [vmem:[%s2703_s3 + $0x68] sm:$0xff] }
  0xae   :  { %v547_v34 = vpop.permute.xlu0 %546  ;;  %990 = vperm.xlu1 %2101, %v1747_v32   ;;  %v518_v46 = vmul.f32 %v489_v35, %v2362_v4  ;;  %v1739_v32 = vld [vmem:[%s2703_s3 + $0x80] sm:$0xff] }
  0xaf   :  { %v568_v37 = vadd.f32 %v547_v34, %v520_v30  ;;  %995 = vperm.xlu0 %2100, %v1748_v29   ;;  %1960 = vmatprep.subr.mxu0 %v577_v31  ;;  %v1703_v29 = vld [vmem:[%s2703_s3 + $0x78] sm:$0xff] }
  0xb0   :  { %1935 = vmatmul.mubr.msk.f32.gmra.mxu0 %vm211_vm0, %v52_v33 }
  0xb1   :  { %v576_v40 = vmax.f32 %v568_v37, 0.0  ;;  %1961 = vmatpush3.msra.mxu0 %v577_v31  ;;  %1972 = vmatprep.mubr.msk.f32.mxu0 %vm211_vm0, %v1696_v36  ;;  %v484_v43 = vpop.permute.xlu1 %483 }
  0xb2   :  { %v542_v42 = vpop.permute.xlu0 %541  ;;  %1428 = vperm.xlu1 %2101, %v1796_v41   ;;  %v517_v53 = vmul.f32 %v484_v43, %v2362_v4 }
  0xb3   :  { %v567_v44 = vadd.f32 %v542_v42, %v519_v39  ;;  %1433 = vperm.xlu0 %2100, %v1797_v38   ;;  %1962 = vmatprep.subr.mxu0 %v576_v40 }
  0xb4   :  { %1963 = vmatpush3.msra.mxu0 %v576_v40 }
  0xb5   :  { %v575_v47 = vmax.f32 %v567_v44, 0.0  ;;  %v479_v50 = vpop.permute.xlu1 %478 }
  0xb6   :  { %v537_v49 = vpop.permute.xlu0 %536  ;;  %1418 = vperm.xlu1 %2101, %v1794_v48   ;;  %v516_v55 = vmul.f32 %v479_v50, %v2362_v4 }
  0xb7   :  { %v566_v51 = vadd.f32 %v537_v49, %v518_v46  ;;  %1423 = vperm.xlu0 %2100, %v1795_v45   ;;  %1964 = vmatprep.subr.mxu0 %v575_v47 }
  0xb8   :  { %1965 = vmatpush3.msra.mxu0 %v575_v47 }
  0xb9   :  { %v574_v54 = vmax.f32 %v566_v51, 0.0  ;;  %v527_v58 = vpop.permute.xlu1 %526 }
  0xba   :  { %v532_v57 = vpop.permute.xlu0 %531  ;;  %v564_v60 = vadd.f32 %v527_v58, %v516_v55  ;;  %1408 = vperm.xlu1 %2101, %v1792_v56  }
  0xbb   :  { %v565_v59 = vadd.f32 %v532_v57, %v517_v53  ;;  %1413 = vperm.xlu0 %2100, %v1793_v52   ;;  %1966 = vmatprep.subr.mxu0 %v574_v54  ;;  %v1740_v57 = vld [vmem:[%s2703_s3 + $0x88] sm:$0xff] }
  0xbc   :  { %1967 = vmatpush3.msra.mxu0 %v574_v54  ;;  %v572_v2 = vmax.f32 %v564_v60, 0.0 }
  0xbd   :  { %v573_v62 = vmax.f32 %v565_v59, 0.0  ;;  %v917_v1 = vpop.permute.xlu1 %916  ;;  %v1741_v59 = vld [vmem:[%s2703_s3 + $0x90] sm:$0xff] }
  0xbe   :  { %v922_v0 = vpop.permute.xlu0 %921  ;;  %1398 = vperm.xlu1 %2101, %v1790_v63   ;;  %v930_v15 = vmul.f32 %v917_v1, %v2362_v4  ;;  %v1742_v63 = vld [vmem:[%s2703_s3 + $0x98] sm:$0xff] }
  0xbf   :  { %1403 = vperm.xlu0 %2100, %v1791_v61   ;;  %1968 = vmatprep.subr.mxu0 %v573_v62  ;;  %v931_v7 = vmul.f32 %v922_v0, %v2362_v4 }
  0xc0   :  { %1969 = vmatpush3.msra.mxu0 %v573_v62 }
  0xc1   :  { %1970 = vmatprep.subr.mxu0 %v572_v2  ;;  %v912_v11 = vpop.permute.xlu1 %911 }
  0xc2   :  { %v970_v10 = vpop.permute.xlu0 %969  ;;  %1971 = vmatpush3.msra.mxu0 %v572_v2  ;;  %759 = vperm.xlu1 %2101, %v1713_v8   ;;  %v929_v23 = vmul.f32 %v912_v11, %v2362_v4  ;;  %v1743_v2 = vld [vmem:[%s2703_s3 + $0xa0] sm:$0xff]  ;;  %v1744_v8 = vld [vmem:[%s2703_s3 + $0xa8] sm:$0xff]  ;;  %v1745_v11 = vld [vmem:[%s2703_s3 + $0xb0] sm:$0xff] }
  0xc3   :  { %v979_v12 = vadd.f32 %v970_v10, %v931_v7  ;;  %351 = vperm.xlu0 %2100, %v62_v5   ;;  %1973 = vmatmul.mubr.msk.f32.vlgmr.msra.gmra.mxu0 %vm211_vm0, %v1697_v6 }
  0xc4   :  { %1975 = vmatprep.mubr.msk.f32.mxu0 %vm211_vm0, %v1698_v9 }
  0xc5   :  { %v987_v16 = vmax.f32 %v979_v12, 0.0  ;;  %v907_v19 = vpop.permute.xlu1 %906 }
  0xc6   :  { %v965_v18 = vpop.permute.xlu0 %964  ;;  %1575 = vperm.xlu1 %2101, %v1799_v17   ;;  %v928_v30 = vmul.f32 %v907_v19, %v2362_v4 }
  0xc7   :  { %v978_v21 = vadd.f32 %v965_v18, %v930_v15  ;;  %1167 = vperm.xlu0 %2100, %v1756_v13   ;;  %1976 = vmatmul.mubr.msk.f32.gmra.mxu0 %vm211_vm0, %v1699_v14  ;;  %v1746_v15 = vld [vmem:[%s2703_s3 + $0xb8] sm:$0xff]  ;;  %v1782_v18 = vld [vmem:[%s2703_s3 + $0xc0] sm:$0xff] }
  0xc8   :  { %2003 = vmatprep.subr.mxu0 %v987_v16  ;;  %1978 = vmatprep.mubr.msk.f32.mxu0 %vm211_vm0, %v1700_v20 }
  0xc9   :  { %v986_v24 = vmax.f32 %v978_v21, 0.0  ;;  %2004 = vmatpush3.msra.mxu0 %v987_v16  ;;  %v902_v27 = vpop.permute.xlu1 %901 }
  0xca   :  { %v960_v26 = vpop.permute.xlu0 %959  ;;  %v927_v36 = vmul.f32 %v902_v27, %v2362_v4  ;;  %v2119_v27 = vmov 0.0  }
  0xcb   :  { %v977_v28 = vadd.f32 %v960_v26, %v929_v23  ;;  %1979 = vmatmul.mubr.msk.f32.gmra.mxu0 %vm211_vm0, %v1701_v22  ;;  %2005 = vmatprep.subr.mxu0 %v986_v24 }
  0xcc   :  { %2006 = vmatpush3.msra.mxu0 %v986_v24  ;;  %1981 = vmatprep.mubr.msk.f32.mxu0 %vm211_vm0, %v1702_v25 }
  0xcd   :  { %v985_v31 = vmax.f32 %v977_v28, 0.0  ;;  %v897_v34 = vpop.permute.xlu1 %896  ;;  %1937 = vmatprep.subr.mxu1 %v2119_v27  ;;  %1953 = vmatprep.mubr.msk.f32.mxu1 %vm2120_vm1, %v2119_v27 }
  0xce   :  { %v955_v33 = vpop.permute.xlu0 %954  ;;  %v926_v41 = vmul.f32 %v897_v34, %v2362_v4 }
  0xcf   :  { %v976_v35 = vadd.f32 %v955_v33, %v928_v30  ;;  %1982 = vmatmul.mubr.msk.f32.gmra.mxu0 %vm211_vm0, %v1703_v29  ;;  %2007 = vmatprep.subr.mxu0 %v985_v31 }
  0xd0   :  { %2008 = vmatpush3.msra.mxu0 %v985_v31  ;;  %2019 = vmatprep.mubr.msk.f32.mxu0 %vm211_vm0, %v1739_v32 }
  0xd1   :  { %v984_v37 = vmax.f32 %v976_v35, 0.0  ;;  %v892_v39 = vpop.permute.xlu1 %891 }
  0xd2   :  { %v950_v38 = vpop.permute.xlu0 %949  ;;  %v925_v46 = vmul.f32 %v892_v39, %v2362_v4 }
  0xd3   :  { %v975_v40 = vadd.f32 %v950_v38, %v927_v36  ;;  %2009 = vmatprep.subr.mxu0 %v984_v37 }
  0xd4   :  { %2010 = vmatpush3.msra.mxu0 %v984_v37 }
  0xd5   :  { %v983_v42 = vmax.f32 %v975_v40, 0.0  ;;  %v887_v44 = vpop.permute.xlu1 %886 }
  0xd6   :  { %v945_v43 = vpop.permute.xlu0 %944  ;;  %v924_v48 = vmul.f32 %v887_v44, %v2362_v4  ;;  %v1786_v44 = vld [vmem:[%s2703_s3 + $0xe0] sm:$0xff] }
  0xd7   :  { %v974_v45 = vadd.f32 %v945_v43, %v926_v41  ;;  %2011 = vmatprep.subr.mxu0 %v983_v42  ;;  %v1784_v43 = vld [vmem:[%s2703_s3 + $0xd0] sm:$0xff] }
  0xd8   :  { %2012 = vmatpush3.msra.mxu0 %v983_v42  ;;  %v1783_v42 = vld [vmem:[%s2703_s3 + $0xc8] sm:$0xff] }
  0xd9   :  { %v982_v47 = vmax.f32 %v974_v45, 0.0  ;;  %v935_v50 = vpop.permute.xlu1 %934  ;;  %v1787_v45 = vld [vmem:[%s2703_s3 + $0xe8] sm:$0xff] }
  0xda   :  { %v940_v49 = vpop.permute.xlu0 %939  ;;  %v972_v52 = vadd.f32 %v935_v50, %v924_v48 }
  0xdb   :  { %v973_v51 = vadd.f32 %v940_v49, %v925_v46  ;;  %2013 = vmatprep.subr.mxu0 %v982_v47  ;;  %v1788_v46 = vld [vmem:[%s2703_s3 + $0xf0] sm:$0xff] }
  0xdc   :  { %2014 = vmatpush3.msra.mxu0 %v982_v47  ;;  %v980_v56 = vmax.f32 %v972_v52, 0.0  ;;  %v1789_v47 = vld [vmem:[%s2703_s3 + $0xf8] sm:$0xff] }
  0xdd   :  { %v981_v53 = vmax.f32 %v973_v51, 0.0  ;;  %v1325_v55 = vpop.permute.xlu1 %1324 }
  0xde   :  { %v1330_v54 = vpop.permute.xlu0 %1329  ;;  %v1338_v0 = vmul.f32 %v1325_v55, %v2362_v4 }
  0xdf   :  { %2015 = vmatprep.subr.mxu0 %v981_v53  ;;  %v1339_v58 = vmul.f32 %v1330_v54, %v2362_v4 }
  0xe0   :  { %2016 = vmatpush3.msra.mxu0 %v981_v53 }
  0xe1   :  { %2017 = vmatprep.subr.mxu0 %v980_v56  ;;  %v1320_v61 = vpop.permute.xlu1 %1319 }
  0xe2   :  { %v1378_v60 = vpop.permute.xlu0 %1377  ;;  %2018 = vmatpush3.msra.mxu0 %v980_v56  ;;  %v1337_v9 = vmul.f32 %v1320_v61, %v2362_v4 }
  0xe3   :  { %v1387_v62 = vadd.f32 %v1378_v60, %v1339_v58  ;;  %2020 = vmatmul.mubr.msk.f32.vlgmr.msra.gmra.mxu0 %vm211_vm0, %v1740_v57 }
  0xe4   :  { %2022 = vmatprep.mubr.msk.f32.mxu0 %vm211_vm0, %v1741_v59 }
  0xe5   :  { %v1395_v1 = vmax.f32 %v1387_v62, 0.0  ;;  %v1315_v6 = vpop.permute.xlu1 %1314 }
  0xe6   :  { %v1373_v5 = vpop.permute.xlu0 %1372  ;;  %v1336_v16 = vmul.f32 %v1315_v6, %v2362_v4 }
  0xe7   :  { %v1386_v7 = vadd.f32 %v1373_v5, %v1338_v0  ;;  %2023 = vmatmul.mubr.msk.f32.gmra.mxu0 %vm211_vm0, %v1742_v63  ;;  %2050 = vmatprep.subr.mxu0 %v1395_v1 }
  0xe8   :  { %2051 = vmatpush3.msra.mxu0 %v1395_v1  ;;  %2025 = vmatprep.mubr.msk.f32.mxu0 %vm211_vm0, %v1743_v2 }
  0xe9   :  { %v1394_v10 = vmax.f32 %v1386_v7, 0.0  ;;  %v1310_v13 = vpop.permute.xlu1 %1309 }
  0xea   :  { %v1368_v12 = vpop.permute.xlu0 %1367  ;;  %v1335_v22 = vmul.f32 %v1310_v13, %v2362_v4 }
  0xeb   :  { %v1385_v14 = vadd.f32 %v1368_v12, %v1337_v9  ;;  %2026 = vmatmul.mubr.msk.f32.gmra.mxu0 %vm211_vm0, %v1744_v8  ;;  %2052 = vmatprep.subr.mxu0 %v1394_v10 }
  0xec   :  { %2053 = vmatpush3.msra.mxu0 %v1394_v10  ;;  %2028 = vmatprep.mubr.msk.f32.mxu0 %vm211_vm0, %v1745_v11 }
  0xed   :  { %v1393_v17 = vmax.f32 %v1385_v14, 0.0  ;;  %v1305_v20 = vpop.permute.xlu1 %1304 }
  0xee   :  { %v1363_v19 = vpop.permute.xlu0 %1362  ;;  %v1334_v28 = vmul.f32 %v1305_v20, %v2362_v4 }
  0xef   :  { %v1384_v21 = vadd.f32 %v1363_v19, %v1336_v16  ;;  %2029 = vmatmul.mubr.msk.f32.gmra.mxu0 %vm211_vm0, %v1746_v15  ;;  %2054 = vmatprep.subr.mxu0 %v1393_v17 }
  0xf0   :  { %2055 = vmatpush3.msra.mxu0 %v1393_v17  ;;  %2066 = vmatprep.mubr.msk.f32.mxu0 %vm211_vm0, %v1782_v18  ;;  %v61_v18 = vld [vmem:[%s2707_s5] sm:$0x3] }
  0xf1   :  { %v1392_v23 = vmax.f32 %v1384_v21, 0.0  ;;  %v1300_v25 = vpop.permute.xlu1 %1299 }
  0xf2   :  { %v1358_v24 = vpop.permute.xlu0 %1357  ;;  %v1333_v33 = vmul.f32 %v1300_v25, %v2362_v4 }
  0xf3   :  { %v1383_v26 = vadd.f32 %v1358_v24, %v1335_v22  ;;  %2056 = vmatprep.subr.mxu0 %v1392_v23 }
  0xf4   :  { %2057 = vmatpush3.msra.mxu0 %v1392_v23 }
  0xf5   :  { %v1391_v29 = vmax.f32 %v1383_v26, 0.0  ;;  %v1295_v31 = vpop.permute.xlu1 %1294 }
  0xf6   :  { %v1353_v30 = vpop.permute.xlu0 %1352  ;;  %v1332_v35 = vmul.f32 %v1295_v31, %v2362_v4  ;;  %v1785_v4 = vld [vmem:[%s2703_s3 + $0xd8] sm:$0xff] }
  0xf7   :  { %v1382_v32 = vadd.f32 %v1353_v30, %v1334_v28  ;;  %2058 = vmatprep.subr.mxu0 %v1391_v29 }
  0xf8   :  { %2059 = vmatpush3.msra.mxu0 %v1391_v29 }
  0xf9   :  { %v1390_v34 = vmax.f32 %v1382_v32, 0.0  ;;  %v1343_v37 = vpop.permute.xlu1 %1342 }
  0xfa   :  { %v1348_v36 = vpop.permute.xlu0 %1347  ;;  %v1380_v39 = vadd.f32 %v1343_v37, %v1332_v35 }
  0xfb   :  { %v1381_v38 = vadd.f32 %v1348_v36, %v1333_v33  ;;  %2060 = vmatprep.subr.mxu0 %v1390_v34 }
  0xfc   :  { %2061 = vmatpush3.msra.mxu0 %v1390_v34  ;;  %v1388_v41 = vmax.f32 %v1380_v39, 0.0 }
  0xfd   :  { %v1389_v40 = vmax.f32 %v1381_v38, 0.0  ;;  %v204_v52 = vpop.permute.xlu1 %203 }
  0xfe   :  { %v209_v50 = vpop.permute.xlu0 %208 }
  0xff   :  { %2062 = vmatprep.subr.mxu0 %v1389_v40 }
 0x100   :  { %2063 = vmatpush3.msra.mxu0 %v1389_v40 }
 0x101   :  { %2064 = vmatprep.subr.mxu0 %v1388_v41  ;;  %v194_v57 = vpop.permute.xlu1 %193 }
 0x102   :  { %2065 = vmatpush3.msra.mxu0 %v1388_v41  ;;  %v199_v55 = vpop.permute.xlu0 %198 }
 0x103   :  { %2067 = vmatmul.mubr.msk.f32.vlgmr.msra.gmra.mxu0 %vm211_vm0, %v1783_v42 }
 0x104   :  { %2069 = vmatprep.mubr.msk.f32.mxu0 %vm211_vm0, %v1784_v43 }
 0x105   :  { %v184_v5 = vpop.permute.xlu1 %183 }
 0x106   :  { %v189_v0 = vpop.permute.xlu0 %188 }
 0x107   :  { %2070 = vmatmul.mubr.msk.f32.gmra.mxu0 %vm211_vm0, %v1785_v4 }
 0x108   :  { %2072 = vmatprep.mubr.msk.f32.mxu0 %vm211_vm0, %v1786_v44 }
 0x109   :  { %v174_v13 = vpop.permute.xlu1 %173 }
 0x10a   :  { %v179_v10 = vpop.permute.xlu0 %178 }
 0x10b   :  { %2073 = vmatmul.mubr.msk.f32.gmra.mxu0 %vm211_vm0, %v1787_v45 }
 0x10c   :  { %2075 = vmatprep.mubr.msk.f32.mxu0 %vm211_vm0, %v1788_v46 }
 0x10d   :  { %v613_v23 = vpop.permute.xlu1 %612 }
 0x10e   :  { %v618_v21 = vpop.permute.xlu0 %617 }
 0x10f   :  { %2076 = vmatmul.mubr.msk.f32.gmra.mxu0 %vm211_vm0, %v1789_v47 }
 0x111   :  { %v603_v29 = vpop.permute.xlu1 %602 }
 0x112   :  { %v608_v26 = vpop.permute.xlu0 %607 }
 0x115   :  { %v593_v39 = vpop.permute.xlu1 %592 }
 0x116   :  { %v598_v36 = vpop.permute.xlu0 %597 }
 0x119   :  { %v583_v46 = vpop.permute.xlu1 %582 }
 0x11a   :  { %v588_v4 = vpop.permute.xlu0 %587 }
 0x163   :  { %v1927_v48 = vpop.f32.mrf.mxu0 }
 0x164   :  { %v308_v11 = vadd.f32 %v1927_v48, %v179_v10 }
 0x165   :  { %v302_v49 = vpop.f32.mrf.mxu0 }
 0x166   :  { %v303_v14 = vadd.f32 %v302_v49, %v174_v13  ;;  %v342_v16 = vmax.f32 %v308_v11, 0.0 }
 0x168   :  { %v1930_v51 = vpop.f32.mrf.mxu0  ;;  %v341_v17 = vmax.f32 %v303_v14, 0.0 }
 0x169   :  { %v318_v6 = vadd.f32 %v1930_v51, %v189_v0  ;;  %v1712_v51 = vld [vmem:[%s2707_s5 + $0x2] sm:$0x3] }
 0x16a   :  { %v312_v53 = vpop.f32.mrf.mxu0 }
 0x16b   :  { %v313_v8 = vadd.f32 %v312_v53, %v184_v5  ;;  %v344_v12 = vmax.f32 %v318_v6, 0.0 }
 0x16c   :  { %v1933_v54 = vpop.f32.mrf.mxu0 }
 0x16d   :  { %v328_v61 = vadd.f32 %v1933_v54, %v199_v55  ;;  %v343_v15 = vmax.f32 %v313_v8, 0.0  ;;  %v1026_v54 = vpop.permute.xlu0 %1025 }
 0x16e   :  { %v322_v56 = vpop.f32.mrf.mxu0 }
 0x16f   :  { %v323_v1 = vadd.f32 %v322_v56, %v194_v57  ;;  %v346_v7 = vmax.f32 %v328_v61, 0.0  ;;  %v1021_v56 = vpop.permute.xlu1 %1020 }
 0x170   :  { %v1936_v58 = vpop.f32.mrf.mxu0 }
 0x171   :  { %v338_v59 = vadd.f32 %v1936_v58, %v209_v50  ;;  %v345_v9 = vmax.f32 %v323_v1, 0.0 }
 0x172   :  { %v332_v60 = vpop.f32.mrf.mxu0 }
 0x173   :  { %v348_v62 = vmax.f32 %v338_v59, 0.0  ;;  %v333_v63 = vadd.f32 %v332_v60, %v204_v52  ;;  %v1016_v59 = vpop.permute.xlu0 %1015  ;;  %v1011_v61 = vpop.permute.xlu1 %1010 }
 0x175   :  { %v347_v2 = vmax.f32 %v333_v63, 0.0  ;;  %1938 = vmatpush3.msra.mxu1 %v348_v62 }
 0x176   :  { %1939 = vmatprep.subr.mxu1 %v2119_v27 }
 0x177   :  { %1940 = vmatpush3.msra.mxu1 %v347_v2  ;;  %v1006_v6 = vpop.permute.xlu0 %1005 }
 0x178   :  { %1941 = vmatprep.subr.mxu1 %v2119_v27 }
 0x179   :  { %1942 = vmatpush3.msra.mxu1 %v346_v7 }
 0x17a   :  { %1943 = vmatprep.subr.mxu1 %v2119_v27 }
 0x17b   :  { %1944 = vmatpush3.msra.mxu1 %v345_v9  ;;  %v1001_v9 = vpop.permute.xlu1 %1000  ;;  %v996_v14 = vpop.permute.xlu0 %995 }
 0x17c   :  { %1945 = vmatprep.subr.mxu1 %v2119_v27 }
 0x17d   :  { %1946 = vmatpush3.msra.mxu1 %v344_v12 }
 0x17e   :  { %1947 = vmatprep.subr.mxu1 %v2119_v27 }
 0x17f   :  { %1948 = vmatpush3.msra.mxu1 %v343_v15 }
 0x180   :  { %1949 = vmatprep.subr.mxu1 %v2119_v27 }
 0x181   :  { %1950 = vmatpush3.msra.mxu1 %v342_v16 }
 0x182   :  { %1951 = vmatprep.subr.mxu1 %v2119_v27 }
 0x183   :  { %1952 = vmatpush3.msra.mxu1 %v341_v17  ;;  %v1974_v19 = vpop.f32.mrf.mxu0  ;;  %v991_v17 = vpop.permute.xlu1 %990 }
 0x184   :  { %1954 = vmatmul.mubr.msk.f32.vlgmr.msra.gmra.mxu1 %vm211_vm0, %v61_v18  ;;  %1984 = vmatprep.subr.mxu1 %v2119_v27  ;;  %v716_v44 = vadd.f32 %v1974_v19, %v588_v4 }
 0x185   :  { %v710_v20 = vpop.f32.mrf.mxu0  ;;  %2000 = vmatprep.mubr.msk.f32.mxu1 %vm2120_vm1, %v2119_v27 }
 0x186   :  { %v711_v47 = vadd.f32 %v710_v20, %v583_v46  ;;  %v750_v49 = vmax.f32 %v716_v44, 0.0 }
 0x187   :  { %v1977_v22 = vpop.f32.mrf.mxu0 }
 0x188   :  { %v726_v40 = vadd.f32 %v1977_v22, %v598_v36  ;;  %v749_v50 = vmax.f32 %v711_v47, 0.0  ;;  %v1755_v22 = vld [vmem:[%s2707_s5 + $0x4] sm:$0x3] }
 0x189   :  { %v720_v24 = vpop.f32.mrf.mxu0 }
 0x18a   :  { %v721_v42 = vadd.f32 %v720_v24, %v593_v39  ;;  %v752_v45 = vmax.f32 %v726_v40, 0.0 }
 0x18b   :  { %v1980_v25 = vpop.f32.mrf.mxu0 }
 0x18c   :  { %v736_v33 = vadd.f32 %v1980_v25, %v608_v26  ;;  %v751_v48 = vmax.f32 %v721_v42, 0.0  ;;  %v1434_v25 = vpop.permute.xlu0 %1433 }
 0x18d   :  { %v730_v28 = vpop.f32.mrf.mxu0 }
 0x18e   :  { %v731_v37 = vadd.f32 %v730_v28, %v603_v29  ;;  %v754_v41 = vmax.f32 %v736_v33, 0.0  ;;  %v1429_v28 = vpop.permute.xlu1 %1428 }
 0x18f   :  { %v1983_v30 = vpop.f32.mrf.mxu0 }
 0x190   :  { %v746_v31 = vadd.f32 %v1983_v30, %v618_v21  ;;  %v753_v43 = vmax.f32 %v731_v37, 0.0 }
 0x191   :  { %v740_v32 = vpop.f32.mrf.mxu0 }
 0x192   :  { %v756_v34 = vmax.f32 %v746_v31, 0.0  ;;  %v741_v35 = vadd.f32 %v740_v32, %v613_v23  ;;  %v1424_v31 = vpop.permute.xlu0 %1423  ;;  %v1419_v33 = vpop.permute.xlu1 %1418 }
 0x194   :  { %v755_v38 = vmax.f32 %v741_v35, 0.0  ;;  %1985 = vmatpush3.msra.mxu1 %v756_v34 }
 0x195   :  { %1986 = vmatprep.subr.mxu1 %v2119_v27 }
 0x196   :  { %1987 = vmatpush3.msra.mxu1 %v755_v38  ;;  %v1414_v40 = vpop.permute.xlu0 %1413 }
 0x197   :  { %1988 = vmatprep.subr.mxu1 %v2119_v27 }
 0x198   :  { %1989 = vmatpush3.msra.mxu1 %v754_v41 }
 0x199   :  { %1990 = vmatprep.subr.mxu1 %v2119_v27 }
 0x19a   :  { %1991 = vmatpush3.msra.mxu1 %v753_v43  ;;  %v1409_v43 = vpop.permute.xlu1 %1408  ;;  %v1404_v47 = vpop.permute.xlu0 %1403 }
 0x19b   :  { %1992 = vmatprep.subr.mxu1 %v2119_v27 }
 0x19c   :  { %1993 = vmatpush3.msra.mxu1 %v752_v45 }
 0x19d   :  { %1994 = vmatprep.subr.mxu1 %v2119_v27 }
 0x19e   :  { %1995 = vmatpush3.msra.mxu1 %v751_v48 }
 0x19f   :  { %1996 = vmatprep.subr.mxu1 %v2119_v27 }
 0x1a0   :  { %1997 = vmatpush3.msra.mxu1 %v750_v49 }
 0x1a1   :  { %1998 = vmatprep.subr.mxu1 %v2119_v27 }
 0x1a2   :  { %1999 = vmatpush3.msra.mxu1 %v749_v50  ;;  %v1399_v50 = vpop.permute.xlu1 %1398 }
 0x1a3   :  { %2001 = vmatmul.mubr.msk.f32.vlgmr.msra.gmra.mxu1 %vm211_vm0, %v1712_v51  ;;  %v2021_v52 = vpop.f32.mrf.mxu0  ;;  %2031 = vmatprep.subr.mxu1 %v2119_v27 }
 0x1a4   :  { %2047 = vmatprep.mubr.msk.f32.mxu1 %vm2120_vm1, %v2119_v27  ;;  %v1124_v15 = vadd.f32 %v2021_v52, %v996_v14 }
 0x1a5   :  { %v1118_v53 = vpop.f32.mrf.mxu0 }
 0x1a6   :  { %v1119_v18 = vadd.f32 %v1118_v53, %v991_v17  ;;  %v1158_v20 = vmax.f32 %v1124_v15, 0.0 }
 0x1a7   :  { %v2024_v55 = vpop.f32.mrf.mxu0 }
 0x1a8   :  { %v1134_v10 = vadd.f32 %v2024_v55, %v1006_v6  ;;  %v1157_v21 = vmax.f32 %v1119_v18, 0.0  ;;  %v1798_v55 = vld [vmem:[%s2707_s5 + $0x6] sm:$0x3] }
 0x1a9   :  { %v1128_v57 = vpop.f32.mrf.mxu0 }
 0x1aa   :  { %v1129_v12 = vadd.f32 %v1128_v57, %v1001_v9  ;;  %v1160_v16 = vmax.f32 %v1134_v10, 0.0 }
 0x1ab   :  { %v2027_v58 = vpop.f32.mrf.mxu0 }
 0x1ac   :  { %v1144_v1 = vadd.f32 %v2027_v58, %v1016_v59  ;;  %v1159_v19 = vmax.f32 %v1129_v12, 0.0 }
 0x1ad   :  { %v1138_v60 = vpop.f32.mrf.mxu0 }
 0x1ae   :  { %v1139_v7 = vadd.f32 %v1138_v60, %v1011_v61  ;;  %v1162_v11 = vmax.f32 %v1144_v1, 0.0 }
 0x1af   :  { %v2030_v62 = vpop.f32.mrf.mxu0 }
 0x1b0   :  { %v1154_v63 = vadd.f32 %v2030_v62, %v1026_v54  ;;  %v1161_v13 = vmax.f32 %v1139_v7, 0.0  ;;  %v352_v62 = vpop.permute.xlu0 %351 }
 0x1b1   :  { %v1148_v0 = vpop.f32.mrf.mxu0 }
 0x1b2   :  { %v1164_v2 = vmax.f32 %v1154_v63, 0.0  ;;  %v1149_v5 = vadd.f32 %v1148_v0, %v1021_v56  ;;  %v760_v0 = vpop.permute.xlu1 %759 }
 0x1b4   :  { %v1163_v8 = vmax.f32 %v1149_v5, 0.0  ;;  %2032 = vmatpush3.msra.mxu1 %v1164_v2 }
 0x1b5   :  { %2033 = vmatprep.subr.mxu1 %v2119_v27 }
 0x1b6   :  { %2034 = vmatpush3.msra.mxu1 %v1163_v8  ;;  %v1576_v9 = vpop.permute.xlu1 %1575 }
 0x1b7   :  { %2035 = vmatprep.subr.mxu1 %v2119_v27 }
 0x1b8   :  { %2036 = vmatpush3.msra.mxu1 %v1162_v11 }
 0x1b9   :  { %2037 = vmatprep.subr.mxu1 %v2119_v27 }
 0x1ba   :  { %2038 = vmatpush3.msra.mxu1 %v1161_v13 }
 0x1bb   :  { %2039 = vmatprep.subr.mxu1 %v2119_v27 }
 0x1bc   :  { %2040 = vmatpush3.msra.mxu1 %v1160_v16 }
 0x1bd   :  { %2041 = vmatprep.subr.mxu1 %v2119_v27 }
 0x1be   :  { %2042 = vmatpush3.msra.mxu1 %v1159_v19 }
 0x1bf   :  { %2043 = vmatprep.subr.mxu1 %v2119_v27 }
 0x1c0   :  { %2044 = vmatpush3.msra.mxu1 %v1158_v20 }
 0x1c1   :  { %2045 = vmatprep.subr.mxu1 %v2119_v27 }
 0x1c2   :  { %2046 = vmatpush3.msra.mxu1 %v1157_v21 }
 0x1c3   :  { %2048 = vmatmul.mubr.msk.f32.vlgmr.msra.gmra.mxu1 %vm211_vm0, %v1755_v22  ;;  %v2068_v23 = vpop.f32.mrf.mxu0  ;;  %2078 = vmatprep.subr.mxu1 %v2119_v27 }
 0x1c4   :  { %2094 = vmatprep.mubr.msk.f32.mxu1 %vm2120_vm1, %v2119_v27  ;;  %v1532_v48 = vadd.f32 %v2068_v23, %v1404_v47 }
 0x1c5   :  { %v1526_v24 = vpop.f32.mrf.mxu0 }
 0x1c6   :  { %v1527_v51 = vadd.f32 %v1526_v24, %v1399_v50  ;;  %v1566_v53 = vmax.f32 %v1532_v48, 0.0 }
 0x1c7   :  { %v2071_v26 = vpop.f32.mrf.mxu0 }
 0x1c8   :  { %v1542_v4 = vadd.f32 %v2071_v26, %v1414_v40  ;;  %v1565_v54 = vmax.f32 %v1527_v51, 0.0 }
 0x1c9   :  { %v1536_v29 = vpop.f32.mrf.mxu0 }
 0x1ca   :  { %v1537_v45 = vadd.f32 %v1536_v29, %v1409_v43  ;;  %v1568_v49 = vmax.f32 %v1542_v4, 0.0 }
 0x1cb   :  { %v2074_v30 = vpop.f32.mrf.mxu0 }
 0x1cc   :  { %v1552_v37 = vadd.f32 %v2074_v30, %v1424_v31  ;;  %v1567_v52 = vmax.f32 %v1537_v45, 0.0 }
 0x1cd   :  { %v1546_v32 = vpop.f32.mrf.mxu0 }
 0x1ce   :  { %v1547_v41 = vadd.f32 %v1546_v32, %v1419_v33  ;;  %v1570_v44 = vmax.f32 %v1552_v37, 0.0 }
 0x1cf   :  { %v2077_v34 = vpop.f32.mrf.mxu0 }
 0x1d0   :  { %v1562_v35 = vadd.f32 %v2077_v34, %v1434_v25  ;;  %v1569_v46 = vmax.f32 %v1547_v41, 0.0 }
 0x1d1   :  { %v1556_v36 = vpop.f32.mrf.mxu0 }
 0x1d2   :  { %v1572_v38 = vmax.f32 %v1562_v35, 0.0  ;;  %v1557_v39 = vadd.f32 %v1556_v36, %v1429_v28 }
 0x1d4   :  { %v1571_v42 = vmax.f32 %v1557_v39, 0.0  ;;  %2079 = vmatpush3.msra.mxu1 %v1572_v38 }
 0x1d5   :  { %2080 = vmatprep.subr.mxu1 %v2119_v27 }
 0x1d6   :  { %2081 = vmatpush3.msra.mxu1 %v1571_v42 }
 0x1d7   :  { %2082 = vmatprep.subr.mxu1 %v2119_v27 }
 0x1d8   :  { %2083 = vmatpush3.msra.mxu1 %v1570_v44 }
 0x1d9   :  { %2084 = vmatprep.subr.mxu1 %v2119_v27 }
 0x1da   :  { %2085 = vmatpush3.msra.mxu1 %v1569_v46 }
 0x1db   :  { %2086 = vmatprep.subr.mxu1 %v2119_v27 }
 0x1dc   :  { %2087 = vmatpush3.msra.mxu1 %v1568_v49 }
 0x1dd   :  { %2088 = vmatprep.subr.mxu1 %v2119_v27 }
 0x1de   :  { %2089 = vmatpush3.msra.mxu1 %v1567_v52 }
 0x1df   :  { %2090 = vmatprep.subr.mxu1 %v2119_v27 }
 0x1e0   :  { %2091 = vmatpush3.msra.mxu1 %v1566_v53 }
 0x1e1   :  { %2092 = vmatprep.subr.mxu1 %v2119_v27  ;;  %v1168_v27 = vpop.permute.xlu0 %1167 }
 0x1e2   :  { %2093 = vmatpush3.msra.mxu1 %v1565_v54 }
 0x1e3   :  { %2095 = vmatmul.mubr.msk.f32.vlgmr.msra.gmra.mxu1 %vm211_vm0, %v1798_v55 }
 0x244   :  { %v423_v56 = vpop.f32.mrf.mxu1 }
 0x245   :  { %v424_v63 = vadd.f32 %v423_v56, %v352_v62 }
 0x246   :  { %v1955_v57 = vpop.f32.mrf.mxu1 }
 0x247   :  { %2102 = vtanh.f32 %v424_v63 }
 0x254   :  { %v2103_v5 = vpop.eup %2102 }
 0x255   :  { %v428_v6 = vmul.f32 1.442695, %v2103_v5 }
 0x263   :  { %v831_v58 = vpop.f32.mrf.mxu1 }
 0x264   :  { %v832_v1 = vadd.f32 %v831_v58, %v760_v0 }
 0x265   :  { %v2002_v59 = vpop.f32.mrf.mxu1 }
 0x266   :  { %2104 = vtanh.f32 %v832_v1 }
 0x273   :  { %v2105_v7 = vpop.eup %2104 }
 0x274   :  { %v836_v8 = vmul.f32 1.442695, %v2105_v7  ;;  %v843_v17 = vadd.f32 %v2105_v7, %v2103_v5 }
 0x283   :  { %v1239_v60 = vpop.f32.mrf.mxu1 }
 0x284   :  { %v1240_v2 = vadd.f32 %v1239_v60, %v1168_v27 }
 0x285   :  { %v2049_v61 = vpop.f32.mrf.mxu1 }
 0x286   :  { %2106 = vtanh.f32 %v1240_v2 }
 0x287   :  { %2108 = vpow2.f32 %v428_v6 }
 0x288   :  { %2110 = vpow2.f32 %v836_v8 }
 0x293   :  { %v2107_v12 = vpop.eup %2106 }
 0x294   :  { %v1244_v14 = vmul.f32 1.442695, %v2107_v12  ;;  %v2109_v15 = vpop.eup %2108  ;;  %v1251_v19 = vadd.f32 %v2107_v12, %v843_v17 }
 0x295   :  { %v431_v16 = vrot.slane %v2109_v15, 7  ;;  %v2111_v18 = vpop.eup %2110 }
 0x296   :  { %v839_v24 = vrot.slane %v2111_v18, 7 }
 0x297   :  { %v433_v21 = vmul.f32 %v431_v16, %v2359_v3 }
 0x299   :  { %v434_v25 = vadd.f32 %v433_v21, %v424_v63 }
 0x29b   :  { %v841_v28 = vmul.f32 %v839_v24, %v434_v25 }
 0x29d   :  { %v842_v30 = vadd.f32 %v841_v28, %v832_v1 }
 0x2a3   :  { %v1647_v10 = vpop.f32.mrf.mxu1 }
 0x2a4   :  { %v1648_v11 = vadd.f32 %v1647_v10, %v1576_v9 }
 0x2a5   :  { %v2096_v13 = vpop.f32.mrf.mxu1 }
 0x2a6   :  { %2112 = vtanh.f32 %v1648_v11 }
 0x2a7   :  { %2114 = vpow2.f32 %v1244_v14 }
 0x2b3   :  { %v2113_v20 = vpop.eup %2112 }
 0x2b4   :  { %v1652_v22 = vmul.f32 1.442695, %v2113_v20  ;;  %v1659_v23 = vadd.f32 %v2113_v20, %v1251_v19  ;;  %v2115_v26 = vpop.eup %2114 }
 0x2b5   :  { %v1247_v29 = vrot.slane %v2115_v26, 7 }
 0x2b6   :  { %2116 = vpow2.f32 %v1652_v22  ;;  %1662 = vst [vmem:[%s2709_s8] sm:$0x1] %v1659_v23 }
 0x2b7   :  { %v1249_v31 = vmul.f32 %v1247_v29, %v842_v30 }
 0x2b9   :  { %v1250_v33 = vadd.f32 %v1249_v31, %v1240_v2 }
 0x2c3   :  { %v2117_v32 = vpop.eup %2116 }
 0x2c4   :  { %v1655_v34 = vrot.slane %v2117_v32, 7 }
 0x2c6   :  { %v1657_v35 = vmul.f32 %v1655_v34, %v1250_v33 }
 0x2c8   :  { %v1658_v36 = vadd.f32 %v1657_v35, %v1648_v11 }
 0x2ca   :  { %1661 = vst [vmem:[%s2708_s7] sm:$0x2] %v1658_v36 }

</bundles_post_ra>
